<compile_context>
chip_gen: v5e
topology: v5e:2x2
jax: 0.10.0
libtpu: 0.0.40
codegen_flags: <defaults>
</compile_context>

<pallas_src>
import jax
import jax.numpy as jnp
from jax import lax
from jax.experimental import pallas as pl
from jax.experimental.pallas import tpu as pltpu

_EPS = 1e-5
_NEG_SLOPE = 0.2


def _linear_bn_act(h, w, gamma, beta, *, act):
    """y = h @ W (bf16 MXU, f32 acc); BN_train(y); optional LeakyReLU(0.2).

    The Linear bias is intentionally omitted: BatchNorm subtracts the batch
    mean, which cancels any per-feature bias exactly.
    """
    y = jnp.dot(h.astype(jnp.bfloat16), w, preferred_element_type=jnp.float32)
    # BatchNorm1d (training mode): batch statistics over axis 0, biased variance.
    mean = jnp.mean(y, axis=0, keepdims=True)
    centered = y - mean
    var = jnp.mean(jnp.square(centered), axis=0, keepdims=True)
    scale = gamma * lax.rsqrt(var + _EPS)          # fold affine gamma into rsqrt
    y = centered * scale + beta
    if act:
        y = jnp.where(y >= 0.0, y, _NEG_SLOPE * y)
    return y


def _encoder_kernel(x_ref,
                    w0_ref, g0_ref, b0_ref,
                    w1_ref, g1_ref, b1_ref,
                    w2_ref, g2_ref, b2_ref,
                    w3_ref, g3_ref, b3_ref,
                    o_ref):
    """All four LinearBlocks fused; intermediates never leave VMEM."""
    h = x_ref[...].astype(jnp.float32)
    h = _linear_bn_act(h, w0_ref[...], g0_ref[...], b0_ref[...], act=True)   # down[0]
    h = _linear_bn_act(h, w1_ref[...], g1_ref[...], b1_ref[...], act=True)   # down[1]
    h = _linear_bn_act(h, w2_ref[...], g2_ref[...], b2_ref[...], act=False)  # down[2] (act=False)
    h = _linear_bn_act(h, w3_ref[...], g3_ref[...], b3_ref[...], act=True)   # bottleneck
    o_ref[...] = h.astype(o_ref.dtype)


def encoder_forward(x, params):
    """Single fused pallas_call. Whole tensors resident in VMEM (params total
    <0.5 MiB bf16 at these shapes; activations a few tens of KiB).

    # TODO(synk): for large batch N, tile N (two-pass BN sum/sumsq) and add a
    # feature-dim grid with dimension_semantics=("parallel",) for v7x megacore;
    # at N=8 the workload is launch/DMA-bound and a single ungridded call wins.
    """
    flat = [x]
    for (w, g, b) in params:
        flat.extend([w, g, b])
    n = x.shape[0]
    out_dim = params[-1][0].shape[1]
    vmem = pl.BlockSpec(memory_space=pltpu.MemorySpace.VMEM)
    return pl.pallas_call(
        _encoder_kernel,
        out_shape=jax.ShapeDtypeStruct((n, out_dim), jnp.float32),
        in_specs=[vmem] * len(flat),
        out_specs=vmem,
        compiler_params=pltpu.CompilerParams(vmem_limit_bytes=32 * 1024 * 1024),
    )(*flat)


encoder_forward_jit = jax.jit(encoder_forward)


def init_linear_block(key, in_dim, out_dim):
    """Linear weight ~ U(-1/sqrt(in), 1/sqrt(in)) (stored as W.T in bf16);
    Linear bias omitted (cancelled by BN); BatchNorm gamma=1, beta=0 (f32)."""
    bound = 1.0 / float(in_dim) ** 0.5
    w = jax.random.uniform(key, (in_dim, out_dim), dtype=jnp.float32,
                           minval=-bound, maxval=bound).astype(jnp.bfloat16)
    gamma = jnp.ones((1, out_dim), jnp.float32)
    beta = jnp.zeros((1, out_dim), jnp.float32)
    return (w, gamma, beta)


def init_encoder(key, in_dim, out_dim=(512, 256, 128)):
    k0, k1, k2, k3 = jax.random.split(key, 4)
    return [
        init_linear_block(k0, in_dim, out_dim[0]),      # down[0]: norm + act
        init_linear_block(k1, out_dim[0], out_dim[1]),  # down[1]: norm + act
        init_linear_block(k2, out_dim[1], out_dim[2]),  # down[2]: norm, NO act
        init_linear_block(k3, out_dim[2], out_dim[2]),  # bottleneck: norm + act
    ]


def encoder_reference(x, params):
    """Pure-JAX reference mirroring the kernel math (bf16 matmul, f32 BN)."""
    acts = [True, True, False, True]
    h = x.astype(jnp.float32)
    for (w, g, b), act in zip(params, acts):
        y = jnp.dot(h.astype(jnp.bfloat16), w, preferred_element_type=jnp.float32)
        mean = jnp.mean(y, axis=0, keepdims=True)
        c = y - mean
        var = jnp.mean(jnp.square(c), axis=0, keepdims=True)
        y = g * c * lax.rsqrt(var + _EPS) + b
        if act:
            y = jnp.where(y >= 0.0, y, _NEG_SLOPE * y)
        h = y
    return h


if __name__ == "__main__":
    # Small shapes consistent with the module's 2-D (N, features) forward:
    # batch=8 (sublane-aligned), in_dim=128, out_dim=(512, 256, 128) (lane-aligned).
    N, IN_DIM = 8, 128
    OUT_DIM = (512, 256, 128)

    key = jax.random.PRNGKey(0)
    k_params, k_x = jax.random.split(key)
    params = init_encoder(k_params, IN_DIM, OUT_DIM)
    x = jax.random.normal(k_x, (N, IN_DIM), dtype=jnp.float32)

    out = encoder_forward_jit(x, params)
    jax.block_until_ready(out)

    assert out.shape == (N, OUT_DIM[2]), out.shape
    assert jnp.isfinite(out).all()

    ref = encoder_reference(x, params)
    max_err = float(jnp.max(jnp.abs(out - ref)))
    assert max_err < 1e-1, f"max abs error vs reference too large: {max_err}"

    print("KERNEL_OK")
</pallas_src>

<mosaic_0001>
module attributes {stable_mosaic.version = 11 : i64} {
  func.func @_encoder_kernel(%arg0: memref<8x128xf32, #tpu.memory_space<vmem>>, %arg1: memref<128x512xbf16, #tpu.memory_space<vmem>>, %arg2: memref<1x512xf32, #tpu.memory_space<vmem>>, %arg3: memref<1x512xf32, #tpu.memory_space<vmem>>, %arg4: memref<512x256xbf16, #tpu.memory_space<vmem>>, %arg5: memref<1x256xf32, #tpu.memory_space<vmem>>, %arg6: memref<1x256xf32, #tpu.memory_space<vmem>>, %arg7: memref<256x128xbf16, #tpu.memory_space<vmem>>, %arg8: memref<1x128xf32, #tpu.memory_space<vmem>>, %arg9: memref<1x128xf32, #tpu.memory_space<vmem>>, %arg10: memref<128x128xbf16, #tpu.memory_space<vmem>>, %arg11: memref<1x128xf32, #tpu.memory_space<vmem>>, %arg12: memref<1x128xf32, #tpu.memory_space<vmem>>, %arg13: memref<8x128xf32, #tpu.memory_space<vmem>>) attributes {dimension_semantics = [], scalar_prefetch = 0 : i64, scratch_operands = 0 : i64, tpu.core_type = #tpu.core_type<tc>} {
    %c0 = arith.constant 0 : index
    %c0_0 = arith.constant 0 : index
    %0 = vector.load %arg0[%c0, %c0_0] : memref<8x128xf32, #tpu.memory_space<vmem>>, vector<8x128xf32>
    %c0_1 = arith.constant 0 : index
    %c0_2 = arith.constant 0 : index
    %1 = vector.load %arg1[%c0_1, %c0_2] : memref<128x512xbf16, #tpu.memory_space<vmem>>, vector<128x512xbf16>
    %c0_3 = arith.constant 0 : index
    %c0_4 = arith.constant 0 : index
    %2 = vector.load %arg2[%c0_3, %c0_4] : memref<1x512xf32, #tpu.memory_space<vmem>>, vector<1x512xf32>
    %c0_5 = arith.constant 0 : index
    %c0_6 = arith.constant 0 : index
    %3 = vector.load %arg3[%c0_5, %c0_6] : memref<1x512xf32, #tpu.memory_space<vmem>>, vector<1x512xf32>
    %4 = arith.truncf %0 : vector<8x128xf32> to vector<8x128xbf16>
    %cst = arith.constant dense<0.000000e+00> : vector<8x512xf32>
    %5 = tpu.matmul %4, %1, %cst {dimension_numbers = #tpu.dot_dimension_numbers<[1], [0], [0], [1], [0, 0, 1, 1], [], []>} : vector<8x128xbf16>, vector<128x512xbf16>, vector<8x512xf32> -> vector<8x512xf32>
    %cst_7 = arith.constant dense<0.000000e+00> : vector<512xf32>
    %6 = vector.multi_reduction <add>, %5, %cst_7 [0] : vector<8x512xf32> to vector<512xf32>
    %7 = vector.shape_cast %6 : vector<512xf32> to vector<1x512xf32>
    %cst_8 = arith.constant 8.000000e+00 : f32
    %8 = vector.broadcast %cst_8 : f32 to vector<1x512xf32>
    %9 = arith.divf %7, %8 : vector<1x512xf32>
    %10 = vector.broadcast %9 : vector<1x512xf32> to vector<8x512xf32>
    %11 = arith.subf %5, %10 : vector<8x512xf32>
    %12 = arith.mulf %11, %11 : vector<8x512xf32>
    %cst_9 = arith.constant dense<0.000000e+00> : vector<512xf32>
    %13 = vector.multi_reduction <add>, %12, %cst_9 [0] : vector<8x512xf32> to vector<512xf32>
    %14 = vector.shape_cast %13 : vector<512xf32> to vector<1x512xf32>
    %cst_10 = arith.constant 8.000000e+00 : f32
    %15 = vector.broadcast %cst_10 : f32 to vector<1x512xf32>
    %16 = arith.divf %14, %15 : vector<1x512xf32>
    %cst_11 = arith.constant 9.99999974E-6 : f32
    %17 = vector.broadcast %cst_11 : f32 to vector<1x512xf32>
    %18 = arith.addf %16, %17 : vector<1x512xf32>
    %19 = math.rsqrt %18 : vector<1x512xf32>
    %20 = arith.mulf %2, %19 : vector<1x512xf32>
    %21 = vector.broadcast %20 : vector<1x512xf32> to vector<8x512xf32>
    %22 = arith.mulf %11, %21 : vector<8x512xf32>
    %23 = vector.broadcast %3 : vector<1x512xf32> to vector<8x512xf32>
    %24 = arith.addf %22, %23 : vector<8x512xf32>
    %cst_12 = arith.constant 0.000000e+00 : f32
    %25 = vector.broadcast %cst_12 : f32 to vector<8x512xf32>
    %26 = arith.cmpf oge, %24, %25 : vector<8x512xf32>
    %cst_13 = arith.constant 2.000000e-01 : f32
    %27 = vector.broadcast %cst_13 : f32 to vector<8x512xf32>
    %28 = arith.mulf %27, %24 : vector<8x512xf32>
    %29 = arith.select %26, %24, %28 : vector<8x512xi1>, vector<8x512xf32>
    %c0_14 = arith.constant 0 : index
    %c0_15 = arith.constant 0 : index
    %30 = vector.load %arg4[%c0_14, %c0_15] : memref<512x256xbf16, #tpu.memory_space<vmem>>, vector<512x256xbf16>
    %c0_16 = arith.constant 0 : index
    %c0_17 = arith.constant 0 : index
    %31 = vector.load %arg5[%c0_16, %c0_17] : memref<1x256xf32, #tpu.memory_space<vmem>>, vector<1x256xf32>
    %c0_18 = arith.constant 0 : index
    %c0_19 = arith.constant 0 : index
    %32 = vector.load %arg6[%c0_18, %c0_19] : memref<1x256xf32, #tpu.memory_space<vmem>>, vector<1x256xf32>
    %33 = arith.truncf %29 : vector<8x512xf32> to vector<8x512xbf16>
    %cst_20 = arith.constant dense<0.000000e+00> : vector<8x256xf32>
    %34 = tpu.matmul %33, %30, %cst_20 {dimension_numbers = #tpu.dot_dimension_numbers<[1], [0], [0], [1], [0, 0, 1, 1], [], []>} : vector<8x512xbf16>, vector<512x256xbf16>, vector<8x256xf32> -> vector<8x256xf32>
    %cst_21 = arith.constant dense<0.000000e+00> : vector<256xf32>
    %35 = vector.multi_reduction <add>, %34, %cst_21 [0] : vector<8x256xf32> to vector<256xf32>
    %36 = vector.shape_cast %35 : vector<256xf32> to vector<1x256xf32>
    %cst_22 = arith.constant 8.000000e+00 : f32
    %37 = vector.broadcast %cst_22 : f32 to vector<1x256xf32>
    %38 = arith.divf %36, %37 : vector<1x256xf32>
    %39 = vector.broadcast %38 : vector<1x256xf32> to vector<8x256xf32>
    %40 = arith.subf %34, %39 : vector<8x256xf32>
    %41 = arith.mulf %40, %40 : vector<8x256xf32>
    %cst_23 = arith.constant dense<0.000000e+00> : vector<256xf32>
    %42 = vector.multi_reduction <add>, %41, %cst_23 [0] : vector<8x256xf32> to vector<256xf32>
    %43 = vector.shape_cast %42 : vector<256xf32> to vector<1x256xf32>
    %cst_24 = arith.constant 8.000000e+00 : f32
    %44 = vector.broadcast %cst_24 : f32 to vector<1x256xf32>
    %45 = arith.divf %43, %44 : vector<1x256xf32>
    %cst_25 = arith.constant 9.99999974E-6 : f32
    %46 = vector.broadcast %cst_25 : f32 to vector<1x256xf32>
    %47 = arith.addf %45, %46 : vector<1x256xf32>
    %48 = math.rsqrt %47 : vector<1x256xf32>
    %49 = arith.mulf %31, %48 : vector<1x256xf32>
    %50 = vector.broadcast %49 : vector<1x256xf32> to vector<8x256xf32>
    %51 = arith.mulf %40, %50 : vector<8x256xf32>
    %52 = vector.broadcast %32 : vector<1x256xf32> to vector<8x256xf32>
    %53 = arith.addf %51, %52 : vector<8x256xf32>
    %cst_26 = arith.constant 0.000000e+00 : f32
    %54 = vector.broadcast %cst_26 : f32 to vector<8x256xf32>
    %55 = arith.cmpf oge, %53, %54 : vector<8x256xf32>
    %cst_27 = arith.constant 2.000000e-01 : f32
    %56 = vector.broadcast %cst_27 : f32 to vector<8x256xf32>
    %57 = arith.mulf %56, %53 : vector<8x256xf32>
    %58 = arith.select %55, %53, %57 : vector<8x256xi1>, vector<8x256xf32>
    %c0_28 = arith.constant 0 : index
    %c0_29 = arith.constant 0 : index
    %59 = vector.load %arg7[%c0_28, %c0_29] : memref<256x128xbf16, #tpu.memory_space<vmem>>, vector<256x128xbf16>
    %c0_30 = arith.constant 0 : index
    %c0_31 = arith.constant 0 : index
    %60 = vector.load %arg8[%c0_30, %c0_31] : memref<1x128xf32, #tpu.memory_space<vmem>>, vector<1x128xf32>
    %c0_32 = arith.constant 0 : index
    %c0_33 = arith.constant 0 : index
    %61 = vector.load %arg9[%c0_32, %c0_33] : memref<1x128xf32, #tpu.memory_space<vmem>>, vector<1x128xf32>
    %62 = arith.truncf %58 : vector<8x256xf32> to vector<8x256xbf16>
    %cst_34 = arith.constant dense<0.000000e+00> : vector<8x128xf32>
    %63 = tpu.matmul %62, %59, %cst_34 {dimension_numbers = #tpu.dot_dimension_numbers<[1], [0], [0], [1], [0, 0, 1, 1], [], []>} : vector<8x256xbf16>, vector<256x128xbf16>, vector<8x128xf32> -> vector<8x128xf32>
    %cst_35 = arith.constant dense<0.000000e+00> : vector<128xf32>
    %64 = vector.multi_reduction <add>, %63, %cst_35 [0] : vector<8x128xf32> to vector<128xf32>
    %65 = vector.shape_cast %64 : vector<128xf32> to vector<1x128xf32>
    %cst_36 = arith.constant 8.000000e+00 : f32
    %66 = vector.broadcast %cst_36 : f32 to vector<1x128xf32>
    %67 = arith.divf %65, %66 : vector<1x128xf32>
    %68 = vector.broadcast %67 : vector<1x128xf32> to vector<8x128xf32>
    %69 = arith.subf %63, %68 : vector<8x128xf32>
    %70 = arith.mulf %69, %69 : vector<8x128xf32>
    %cst_37 = arith.constant dense<0.000000e+00> : vector<128xf32>
    %71 = vector.multi_reduction <add>, %70, %cst_37 [0] : vector<8x128xf32> to vector<128xf32>
    %72 = vector.shape_cast %71 : vector<128xf32> to vector<1x128xf32>
    %cst_38 = arith.constant 8.000000e+00 : f32
    %73 = vector.broadcast %cst_38 : f32 to vector<1x128xf32>
    %74 = arith.divf %72, %73 : vector<1x128xf32>
    %cst_39 = arith.constant 9.99999974E-6 : f32
    %75 = vector.broadcast %cst_39 : f32 to vector<1x128xf32>
    %76 = arith.addf %74, %75 : vector<1x128xf32>
    %77 = math.rsqrt %76 : vector<1x128xf32>
    %78 = arith.mulf %60, %77 : vector<1x128xf32>
    %79 = vector.broadcast %78 : vector<1x128xf32> to vector<8x128xf32>
    %80 = arith.mulf %69, %79 : vector<8x128xf32>
    %81 = vector.broadcast %61 : vector<1x128xf32> to vector<8x128xf32>
    %82 = arith.addf %80, %81 : vector<8x128xf32>
    %c0_40 = arith.constant 0 : index
    %c0_41 = arith.constant 0 : index
    %83 = vector.load %arg10[%c0_40, %c0_41] : memref<128x128xbf16, #tpu.memory_space<vmem>>, vector<128x128xbf16>
    %c0_42 = arith.constant 0 : index
    %c0_43 = arith.constant 0 : index
    %84 = vector.load %arg11[%c0_42, %c0_43] : memref<1x128xf32, #tpu.memory_space<vmem>>, vector<1x128xf32>
    %c0_44 = arith.constant 0 : index
    %c0_45 = arith.constant 0 : index
    %85 = vector.load %arg12[%c0_44, %c0_45] : memref<1x128xf32, #tpu.memory_space<vmem>>, vector<1x128xf32>
    %86 = arith.truncf %82 : vector<8x128xf32> to vector<8x128xbf16>
    %cst_46 = arith.constant dense<0.000000e+00> : vector<8x128xf32>
    %87 = tpu.matmul %86, %83, %cst_46 {dimension_numbers = #tpu.dot_dimension_numbers<[1], [0], [0], [1], [0, 0, 1, 1], [], []>} : vector<8x128xbf16>, vector<128x128xbf16>, vector<8x128xf32> -> vector<8x128xf32>
    %cst_47 = arith.constant dense<0.000000e+00> : vector<128xf32>
    %88 = vector.multi_reduction <add>, %87, %cst_47 [0] : vector<8x128xf32> to vector<128xf32>
    %89 = vector.shape_cast %88 : vector<128xf32> to vector<1x128xf32>
    %cst_48 = arith.constant 8.000000e+00 : f32
    %90 = vector.broadcast %cst_48 : f32 to vector<1x128xf32>
    %91 = arith.divf %89, %90 : vector<1x128xf32>
    %92 = vector.broadcast %91 : vector<1x128xf32> to vector<8x128xf32>
    %93 = arith.subf %87, %92 : vector<8x128xf32>
    %94 = arith.mulf %93, %93 : vector<8x128xf32>
    %cst_49 = arith.constant dense<0.000000e+00> : vector<128xf32>
    %95 = vector.multi_reduction <add>, %94, %cst_49 [0] : vector<8x128xf32> to vector<128xf32>
    %96 = vector.shape_cast %95 : vector<128xf32> to vector<1x128xf32>
    %cst_50 = arith.constant 8.000000e+00 : f32
    %97 = vector.broadcast %cst_50 : f32 to vector<1x128xf32>
    %98 = arith.divf %96, %97 : vector<1x128xf32>
    %cst_51 = arith.constant 9.99999974E-6 : f32
    %99 = vector.broadcast %cst_51 : f32 to vector<1x128xf32>
    %100 = arith.addf %98, %99 : vector<1x128xf32>
    %101 = math.rsqrt %100 : vector<1x128xf32>
    %102 = arith.mulf %84, %101 : vector<1x128xf32>
    %103 = vector.broadcast %102 : vector<1x128xf32> to vector<8x128xf32>
    %104 = arith.mulf %93, %103 : vector<8x128xf32>
    %105 = vector.broadcast %85 : vector<1x128xf32> to vector<8x128xf32>
    %106 = arith.addf %104, %105 : vector<8x128xf32>
    %cst_52 = arith.constant 0.000000e+00 : f32
    %107 = vector.broadcast %cst_52 : f32 to vector<8x128xf32>
    %108 = arith.cmpf oge, %106, %107 : vector<8x128xf32>
    %cst_53 = arith.constant 2.000000e-01 : f32
    %109 = vector.broadcast %cst_53 : f32 to vector<8x128xf32>
    %110 = arith.mulf %109, %106 : vector<8x128xf32>
    %111 = arith.select %108, %106, %110 : vector<8x128xi1>, vector<8x128xf32>
    %c0_54 = arith.constant 0 : index
    %c0_55 = arith.constant 0 : index
    %112 = vector.load %arg13[%c0_54, %c0_55] : memref<8x128xf32, #tpu.memory_space<vmem>>, vector<8x128xf32>
    tpu.vector_store %arg13[%c0_54, %c0_55], %111 {strides = array<i32>} : memref<8x128xf32, #tpu.memory_space<vmem>>, vector<8x128xf32>,
    return
  }
}

</mosaic_0001>

<bundles_post_ra>
// kernel: encoder_forward.1
= control target key start
LH: loop header
LB: loop body
LE: loop exit
PB: predicated region body
PF: predicated region fallthrough
CT: control target
= control target key end

     0   :  { %18 = vsyncpa [#allocation3], 0  ;;  %s2596_s0 = inlined_call_operand.hbm [shape: f32[8,128], index: 0, kind: input, shape index: {}]   ;;  %s2597_s1 = inlined_call_operand.hbm [shape: bf16[128,512], index: 1, kind: input, shape index: {}]   ;;  %s2598_s2 = inlined_call_operand.hbm [shape: f32[1,512], index: 2, kind: input, shape index: {}]   ;;  %s2599_s3 = inlined_call_operand.hbm [shape: f32[1,512], index: 3, kind: input, shape index: {}]   ;;  %s2600_s4 = inlined_call_operand.hbm [shape: bf16[512,256], index: 4, kind: input, shape index: {}]   ;;  %s2601_s5 = inlined_call_operand.vmem [shape: f32[1,256], index: 5, kind: input, shape index: {}]   ;;  %s2602_s6 = inlined_call_operand.vmem [shape: f32[1,256], index: 6, kind: input, shape index: {}]   ;;  %s2603_s7 = inlined_call_operand.hbm [shape: bf16[256,128], index: 7, kind: input, shape index: {}]   ;;  %s2604_s8 = inlined_call_operand.vmem [shape: f32[1,128], index: 8, kind: input, shape index: {}]   ;;  %s2605_s9 = inlined_call_operand.vmem [shape: f32[1,128], index: 9, kind: input, shape index: {}]   ;;  %s2606_s10 = inlined_call_operand.hbm [shape: bf16[128,128], index: 10, kind: input, shape index: {}]   ;;  %s2607_s11 = inlined_call_operand.vmem [shape: f32[1,128], index: 11, kind: input, shape index: {}]   ;;  %s2608_s12 = inlined_call_operand.vmem [shape: f32[1,128], index: 12, kind: input, shape index: {}]   ;;  %s2609_s13 = inlined_call_operand.hbm [shape: f32[8,128], index: 13, kind: output, shape index: {}]  }
   0x1   :  { %19 = vsyncpa [#allocation6], 0 }
   0x2   :  { %20 = vsyncpa [#allocation9], 0 }
   0x3   :  { %21 = vsyncpa [#allocation12], 0  ;;  %s38_s27 = sshll.u32 %s2597_s1, 4  ;;  %s39_s27 = int_to_ptr.hbm [resolvable:$true] %s38_s27 }
   0x4   :  { %22 = vsyncpa [#allocation4], 0  ;;  %s2309_s28 = smov [#allocation5]   ;;  %s63_s15 = sshll.u32 %s2599_s3, 4  ;;  %s64_s15 = int_to_ptr.hbm [resolvable:$true] %s63_s15 }
   0x5   :  { %s40_s29 = sshll.u32 %s2309_s28, 4  ;;  %s2310_s16 = smov 256   ;;  %s41_s29 = int_to_ptr.vmem [resolvable:$true] %s40_s29 }
   0x6   :  { %s2311_s17 = smov 16   ;;  %s2312_s18 = smov [#allocation8]  }
   0x7   :  { %46 = dma.hbm_to_vmem [thread:$0]  %s39_s27, 4096, %s41_s29, [#allocation6], %s2310_s16, %s2310_s16, %s2311_s17  }
   0x8   :  { %s65_s19 = sshll.u32 %s2312_s18, 4  ;;  %s90_s22 = sshll.u32 %s2603_s7, 4  ;;  %s66_s19 = int_to_ptr.vmem [resolvable:$true] %s65_s19  ;;  %s91_s22 = int_to_ptr.hbm [resolvable:$true] %s90_s22 }
   0x9   :  { %68 = dma.hbm_to_vmem [thread:$0]  %s64_s15, 64, %s66_s19, [#allocation9]  }
   0xa   :  { %s2313_s1 = smov [#allocation11]   ;;  %s28_s3 = sshll.u32 %s2596_s0, 4  ;;  %s29_s3 = int_to_ptr.hbm [resolvable:$true] %s28_s3 }
   0xb   :  { %s92_s23 = sshll.u32 %s2313_s1, 4  ;;  %s2314_s26 = smov 64   ;;  %s93_s23 = int_to_ptr.vmem [resolvable:$true] %s92_s23 }
   0xc   :  { %s2315_s28 = smov 4   ;;  %s2316_s27 = smov [#allocation2]  }
   0xd   :  { %98 = dma.hbm_to_vmem [thread:$0]  %s91_s22, 2048, %s93_s23, [#allocation12], %s2314_s26, %s2314_s26, %s2315_s28  }
   0xe   :  { %s30_s29 = sshll.u32 %s2316_s27, 4  ;;  %s52_s14 = sshll.u32 %s2598_s2, 4  ;;  %s31_s29 = int_to_ptr.vmem [resolvable:$true] %s30_s29  ;;  %s53_s14 = int_to_ptr.hbm [resolvable:$true] %s52_s14 }
   0xf   :  { %33 = dma.hbm_to_vmem [thread:$0]  %s29_s3, 128, %s31_s29, [#allocation3]  }
  0x10   :  { %s73_s0 = sshll.u32 %s2600_s4, 4  ;;  %s2317_s17 = smov [#allocation7]   ;;  %s74_s0 = int_to_ptr.hbm [resolvable:$true] %s73_s0 }
  0x11   :  { %s54_s18 = sshll.u32 %s2317_s17, 4  ;;  %s2318_s19 = smov [#allocation10]   ;;  %s55_s18 = int_to_ptr.vmem [resolvable:$true] %s54_s18 }
  0x12   :  { %57 = dma.hbm_to_vmem [thread:$0]  %s53_s14, 64, %s55_s18, [#allocation6]  }
  0x13   :  { %s75_s20 = sshll.u32 %s2318_s19, 4  ;;  %s2319_s21 = smov 128   ;;  %s76_s20 = int_to_ptr.vmem [resolvable:$true] %s75_s20 }
  0x14   :  { %s2320_s22 = smov 8   ;;  %s107_s23 = sshll.u32 %s2606_s10, 4  ;;  %s108_s23 = int_to_ptr.hbm [resolvable:$true] %s107_s23 }
  0x15   :  { %81 = dma.hbm_to_vmem [thread:$0]  %s74_s0, 8192, %s76_s20, [#allocation9], %s2319_s21, %s2319_s21, %s2320_s22  }
  0x16   :  { %s2321_s24 = smov [#allocation13]  }
  0x17   :  { %s109_s25 = sshll.u32 %s2321_s24, 4  ;;  %s110_s25 = int_to_ptr.vmem [resolvable:$true] %s109_s25 }
  0x18   :  { %115 = dma.hbm_to_vmem [thread:$0]  %s108_s23, 1024, %s110_s25, [#allocation12], %s2314_s26, %s2314_s26, %s2315_s28  }
  0x19   :  { %2299 = dma.done.wait [#allocation3], 128  }
  0x1a   :  { %2300 = vsyncadd [#allocation3], 4294967168 }
  0x1b   :  { %2301 = dma.done.wait [#allocation6], 4160  }
  0x1c   :  { %2302 = vsyncadd [#allocation6], 4294963136 }
  0x1d   :  { %2303 = dma.done.wait [#allocation9], 8256  }
  0x1e   :  { %2304 = vsyncadd [#allocation9], 4294959040 }
  0x1f   :  { %2305 = dma.done.wait [#allocation12], 3072  }
  0x20   :  { %2306 = vsyncadd [#allocation12], 4294964224  ;;  %v1586_v0 = vld [vmem:[#allocation5 + $0xe0] sm:$0xf]  ;;  %v1982_v1 = vld [vmem:[#allocation5 + $0xec] sm:$0xf0] }
  0x21   :  { %v1980_v2 = vld [vmem:[#allocation5 + $0xe4] sm:$0xf]  ;;  %v1587_v3 = vor.u32 %v1982_v1, %v1586_v0  ;;  %v1588_v4 = vld [vmem:[#allocation5 + $0xf0] sm:$0xf0]  ;;  %v1594_v5 = vld [vmem:[#allocation5 + $0xe8] sm:$0xf] }
  0x22   :  { %v1983_v6 = vld [vmem:[#allocation5 + $0xf4] sm:$0xf0]  ;;  %v1591_v7 = vor.u32 %v1980_v2, %v1588_v4  ;;  %v1981_v9 = vld [vmem:[#allocation5 + $0xec] sm:$0xf]  ;;  %v1596_v10 = vld [vmem:[#allocation5 + $0xf8] sm:$0xf0] }
  0x23   :  { %v1595_v8 = vor.u32 %v1983_v6, %v1594_v5  ;;  %v1570_v11 = vld [vmem:[#allocation5 + $0xc0] sm:$0xf]  ;;  %344 = vmatpush.bf16.msra.mxu0 %v1587_v3  ;;  %v1599_v12 = vor.u32 %v1981_v9, %v1596_v10  ;;  %v1978_v13 = vld [vmem:[#allocation5 + $0xcc] sm:$0xf0]  ;;  %v1976_v14 = vld [vmem:[#allocation5 + $0xc4] sm:$0xf] }
  0x24   :  { %v1572_v15 = vld [vmem:[#allocation5 + $0xd0] sm:$0xf0]  ;;  %357 = vmatpush.bf16.msra.mxu1 %v1591_v7  ;;  %v1571_v16 = vor.u32 %v1978_v13, %v1570_v11  ;;  %v1578_v18 = vld [vmem:[#allocation5 + $0xc8] sm:$0xf]  ;;  %v1979_v19 = vld [vmem:[#allocation5 + $0xd4] sm:$0xf0] }
  0x25   :  { %370 = vmatpush.bf16.msra.mxu2 %v1595_v8  ;;  %v1575_v17 = vor.u32 %v1976_v14, %v1572_v15  ;;  %v1977_v20 = vld [vmem:[#allocation5 + $0xcc] sm:$0xf]  ;;  %383 = vmatpush.bf16.msra.mxu3 %v1599_v12  ;;  %v1579_v21 = vor.u32 %v1979_v19, %v1578_v18  ;;  %v1580_v22 = vld [vmem:[#allocation5 + $0xd8] sm:$0xf0]  ;;  %v1554_v23 = vld [vmem:[#allocation5 + $0xa0] sm:$0xf] }
  0x26   :  { %v1974_v24 = vld [vmem:[#allocation5 + $0xac] sm:$0xf0]  ;;  %v1583_v25 = vor.u32 %v1977_v20, %v1580_v22  ;;  %v1972_v26 = vld [vmem:[#allocation5 + $0xa4] sm:$0xf]  ;;  %v1556_v27 = vld [vmem:[#allocation5 + $0xb0] sm:$0xf0] }
  0x27   :  { %v1562_v28 = vld [vmem:[#allocation5 + $0xa8] sm:$0xf]  ;;  %345 = vmatpush.bf16.msra.mxu0 %v1571_v16  ;;  %v1555_v29 = vor.u32 %v1974_v24, %v1554_v23  ;;  %v1975_v30 = vld [vmem:[#allocation5 + $0xb4] sm:$0xf0]  ;;  %v1973_v31 = vld [vmem:[#allocation5 + $0xac] sm:$0xf]  ;;  %v1559_v33 = vor.u32 %v1972_v26, %v1556_v27 }
  0x28   :  { %v1564_v32 = vld [vmem:[#allocation5 + $0xb8] sm:$0xf0]  ;;  %358 = vmatpush.bf16.msra.mxu1 %v1575_v17  ;;  %v1563_v34 = vor.u32 %v1975_v30, %v1562_v28  ;;  %v1538_v35 = vld [vmem:[#allocation5 + $0x80] sm:$0xf]  ;;  %v1970_v36 = vld [vmem:[#allocation5 + $0x8c] sm:$0xf0] }
  0x29   :  { %371 = vmatpush.bf16.msra.mxu2 %v1579_v21  ;;  %v1968_v37 = vld [vmem:[#allocation5 + $0x84] sm:$0xf]  ;;  %384 = vmatpush.bf16.msra.mxu3 %v1583_v25  ;;  %v1567_v38 = vor.u32 %v1973_v31, %v1564_v32  ;;  %v1540_v39 = vld [vmem:[#allocation5 + $0x90] sm:$0xf0]  ;;  %v1546_v40 = vld [vmem:[#allocation5 + $0x88] sm:$0xf]  ;;  %v1539_v44 = vor.u32 %v1970_v36, %v1538_v35 }
  0x2a   :  { %v1971_v41 = vld [vmem:[#allocation5 + $0x94] sm:$0xf0]  ;;  %v1969_v42 = vld [vmem:[#allocation5 + $0x8c] sm:$0xf]  ;;  %v1548_v43 = vld [vmem:[#allocation5 + $0x98] sm:$0xf0]  ;;  %v1543_v45 = vor.u32 %v1968_v37, %v1540_v39 }
  0x2b   :  { %346 = vmatpush.bf16.msra.mxu0 %v1555_v29  ;;  %v1547_v46 = vor.u32 %v1971_v41, %v1546_v40  ;;  %v1522_v47 = vld [vmem:[#allocation5 + $0x60] sm:$0xf]  ;;  %v1966_v48 = vld [vmem:[#allocation5 + $0x6c] sm:$0xf0]  ;;  %v1964_v49 = vld [vmem:[#allocation5 + $0x64] sm:$0xf]  ;;  %v1551_v50 = vor.u32 %v1969_v42, %v1548_v43 }
  0x2c   :  { %359 = vmatpush.bf16.msra.mxu1 %v1559_v33  ;;  %v1524_v51 = vld [vmem:[#allocation5 + $0x70] sm:$0xf0]  ;;  %v1530_v52 = vld [vmem:[#allocation5 + $0x68] sm:$0xf]  ;;  %v1967_v53 = vld [vmem:[#allocation5 + $0x74] sm:$0xf0]  ;;  %v1523_v56 = vor.u32 %v1966_v48, %v1522_v47 }
  0x2d   :  { %372 = vmatpush.bf16.msra.mxu2 %v1563_v34  ;;  %385 = vmatpush.bf16.msra.mxu3 %v1567_v38  ;;  %v1965_v54 = vld [vmem:[#allocation5 + $0x6c] sm:$0xf]  ;;  %v1532_v55 = vld [vmem:[#allocation5 + $0x78] sm:$0xf0]  ;;  %v1527_v57 = vor.u32 %v1964_v49, %v1524_v51  ;;  %v1531_v58 = vor.u32 %v1967_v53, %v1530_v52  ;;  %v1506_v59 = vld [vmem:[#allocation5 + $0x40] sm:$0xf] }
  0x2e   :  { %v1962_v60 = vld [vmem:[#allocation5 + $0x4c] sm:$0xf0]  ;;  %v1960_v61 = vld [vmem:[#allocation5 + $0x44] sm:$0xf]  ;;  %v1535_v62 = vor.u32 %v1965_v54, %v1532_v55  ;;  %v1508_v63 = vld [vmem:[#allocation5 + $0x50] sm:$0xf0] }
  0x2f   :  { %347 = vmatpush.bf16.msra.mxu0 %v1539_v44  ;;  %v1514_v0 = vld [vmem:[#allocation5 + $0x48] sm:$0xf]  ;;  %v1963_v1 = vld [vmem:[#allocation5 + $0x54] sm:$0xf0]  ;;  %v1961_v2 = vld [vmem:[#allocation5 + $0x4c] sm:$0xf]  ;;  %v1507_v4 = vor.u32 %v1962_v60, %v1506_v59  ;;  %v1511_v6 = vor.u32 %v1960_v61, %v1508_v63 }
  0x30   :  { %360 = vmatpush.bf16.msra.mxu1 %v1543_v45  ;;  %v1516_v3 = vld [vmem:[#allocation5 + $0x58] sm:$0xf0]  ;;  %v1490_v5 = vld [vmem:[#allocation5 + $0x20] sm:$0xf]  ;;  %v1515_v7 = vor.u32 %v1963_v1, %v1514_v0  ;;  %v1958_v8 = vld [vmem:[#allocation5 + $0x2c] sm:$0xf0] }
  0x31   :  { %373 = vmatpush.bf16.msra.mxu2 %v1547_v46  ;;  %386 = vmatpush.bf16.msra.mxu3 %v1551_v50  ;;  %v1956_v9 = vld [vmem:[#allocation5 + $0x24] sm:$0xf]  ;;  %v1492_v10 = vld [vmem:[#allocation5 + $0x30] sm:$0xf0]  ;;  %v1519_v11 = vor.u32 %v1961_v2, %v1516_v3  ;;  %v1498_v12 = vld [vmem:[#allocation5 + $0x28] sm:$0xf]  ;;  %v1491_v16 = vor.u32 %v1958_v8, %v1490_v5 }
  0x32   :  { %v1959_v13 = vld [vmem:[#allocation5 + $0x34] sm:$0xf0]  ;;  %v1957_v14 = vld [vmem:[#allocation5 + $0x2c] sm:$0xf]  ;;  %v1500_v15 = vld [vmem:[#allocation5 + $0x38] sm:$0xf0]  ;;  %v1495_v17 = vor.u32 %v1956_v9, %v1492_v10 }
  0x33   :  { %348 = vmatpush.bf16.msra.mxu0 %v1523_v56  ;;  %v1499_v18 = vor.u32 %v1959_v13, %v1498_v12  ;;  %v1474_v19 = vld [vmem:[#allocation5] sm:$0xf]  ;;  %v1954_v20 = vld [vmem:[#allocation5 + $0xc] sm:$0xf0]  ;;  %v1952_v21 = vld [vmem:[#allocation5 + $0x4] sm:$0xf]  ;;  %v1503_v22 = vor.u32 %v1957_v14, %v1500_v15 }
  0x34   :  { %361 = vmatpush.bf16.msra.mxu1 %v1527_v57  ;;  %v1476_v23 = vld [vmem:[#allocation5 + $0x10] sm:$0xf0]  ;;  %v1482_v24 = vld [vmem:[#allocation5 + $0x8] sm:$0xf]  ;;  %v1955_v25 = vld [vmem:[#allocation5 + $0x14] sm:$0xf0]  ;;  %v1475_v28 = vor.u32 %v1954_v20, %v1474_v19 }
  0x35   :  { %374 = vmatpush.bf16.msra.mxu2 %v1531_v58  ;;  %387 = vmatpush.bf16.msra.mxu3 %v1535_v62  ;;  %v1953_v26 = vld [vmem:[#allocation5 + $0xc] sm:$0xf]  ;;  %v1484_v27 = vld [vmem:[#allocation5 + $0x18] sm:$0xf0]  ;;  %v1479_v30 = vor.u32 %v1952_v21, %v1476_v23  ;;  %v1483_v31 = vor.u32 %v1955_v25, %v1482_v24  ;;  %v2322_v34 = vmov 8.0   ;;  %vm518_vm5 = vcmask 1040384  }
  0x36   :  { %v148_v29 = vld [vmem:[#allocation2] sm:$0xff]  ;;  %v1487_v32 = vor.u32 %v1953_v26, %v1484_v27  ;;  %2089 = vrcp.f32 %v2322_v34  ;;  %v1999_v39 = vld [vmem:[#allocation10 + $0x74] sm:$0xf0]  ;;  %v1650_v56 = vld [vmem:[#allocation10 + $0x60] sm:$0xf]  ;;  %vm520_vm10 = vcmask 1042434  }
  0x37   :  { %349 = vmatpush.bf16.msra.mxu0 %v1507_v4  ;;  %v183_v33 = vpack.c.bf16 %v148_v29, %v148_v29  ;;  %v1658_v38 = vld [vmem:[#allocation10 + $0x70] sm:$0xf]  ;;  %v2015_v43 = vld [vmem:[#allocation10 + $0xf4] sm:$0xf0]  ;;  %v1997_v57 = vld [vmem:[#allocation10 + $0x64] sm:$0xf0] }
  0x38   :  { %362 = vmatpush.bf16.msra.mxu1 %v1511_v6  ;;  %v1722_v40 = vld [vmem:[#allocation10 + $0xf0] sm:$0xf]  ;;  %v1659_v42 = vor.u32 %v1999_v39, %v1658_v38  ;;  %v2031_v45 = vld [vmem:[#allocation10 + $0x174] sm:$0xf0]  ;;  %v1714_v58 = vld [vmem:[#allocation10 + $0xe0] sm:$0xf]  ;;  %v1651_v60 = vor.u32 %v1997_v57, %v1650_v56 }
  0x39   :  { %375 = vmatpush.bf16.msra.mxu2 %v1515_v7  ;;  %388 = vmatpush.bf16.msra.mxu3 %v1519_v11  ;;  %v1786_v44 = vld [vmem:[#allocation10 + $0x170] sm:$0xf]  ;;  %v1723_v48 = vor.u32 %v2015_v43, %v1722_v40  ;;  %v2047_v51 = vld [vmem:[#allocation10 + $0x1f4] sm:$0xf0]  ;;  %v2013_v61 = vld [vmem:[#allocation10 + $0xe4] sm:$0xf0] }
  0x3a   :  { %v1787_v49 = vor.u32 %v2031_v45, %v1786_v44  ;;  %v1850_v50 = vld [vmem:[#allocation10 + $0x1f0] sm:$0xf]  ;;  %v1778_v62 = vld [vmem:[#allocation10 + $0x160] sm:$0xf]  ;;  %v2029_v63 = vld [vmem:[#allocation10 + $0x164] sm:$0xf0]  ;;  %v1715_v1 = vor.u32 %v2013_v61, %v1714_v58 }
  0x3b   :  { %350 = vmatpush.bf16.msra.mxu0 %v1491_v16  ;;  %v1851_v54 = vor.u32 %v2047_v51, %v1850_v50  ;;  %v1779_v2 = vor.u32 %v2029_v63, %v1778_v62  ;;  %v1842_v3 = vld [vmem:[#allocation10 + $0x1e0] sm:$0xf]  ;;  %v2045_v4 = vld [vmem:[#allocation10 + $0x1e4] sm:$0xf0]  ;;  %v1642_v10 = vld [vmem:[#allocation10 + $0x50] sm:$0xf] }
  0x3c   :  { %363 = vmatpush.bf16.msra.mxu1 %v1495_v17  ;;  %v2421_v35 = vpop.eup %2089  ;;  %v1843_v7 = vor.u32 %v2045_v4, %v1842_v3  ;;  %v1995_v11 = vld [vmem:[#allocation10 + $0x54] sm:$0xf0]  ;;  %v1706_v12 = vld [vmem:[#allocation10 + $0xd0] sm:$0xf]  ;;  %v1634_v34 = vld [vmem:[#allocation10 + $0x40] sm:$0xf] }
  0x3d   :  { %376 = vmatpush.bf16.msra.mxu2 %v1499_v18  ;;  %389 = vmatpush.bf16.msra.mxu3 %v1503_v22  ;;  %v421_v36 = vmul.f32 8.0, %v2421_v35  ;;  %vm425_vm0 = vweird.f32 %v2421_v35  ;;  %v1643_v17 = vor.u32 %v1995_v11, %v1642_v10  ;;  %v2011_v18 = vld [vmem:[#allocation10 + $0xd4] sm:$0xf0]  ;;  %v1770_v19 = vld [vmem:[#allocation10 + $0x150] sm:$0xf]  ;;  %vm522_vm15 = vcmask 1041408  }
  0x3e   :  { %v1707_v23 = vor.u32 %v2011_v18, %v1706_v12  ;;  %v2027_v24 = vld [vmem:[#allocation10 + $0x154] sm:$0xf0]  ;;  %v1834_v25 = vld [vmem:[#allocation10 + $0x1d0] sm:$0xf]  ;;  %s2323_s30 = smov [#allocation14]   ;;  %s1459_s0 = sshll.u32 %s2609_s13, 4  ;;  %s1460_s0 = int_to_ptr.hbm [resolvable:$true] %s1459_s0 }
  0x3f   :  { %351 = vmatpush.bf16.msra.mxu0 %v1475_v28  ;;  %v422_v37 = vsub.f32 1.0, %v421_v36  ;;  %v1771_v29 = vor.u32 %v2027_v24, %v1770_v19  ;;  %v1993_v36 = vld [vmem:[#allocation10 + $0x44] sm:$0xf0]  ;;  %v1626_v57 = vld [vmem:[#allocation10 + $0x30] sm:$0xf]  ;;  %s1457_s14 = sshll.u32 %s2323_s30, 4  ;;  %s1458_s14 = int_to_ptr.vmem [resolvable:$true] %s1457_s14 }
  0x40   :  { %364 = vmatpush.bf16.msra.mxu1 %v1479_v30  ;;  %v2043_v30 = vld [vmem:[#allocation10 + $0x1d4] sm:$0xf0]  ;;  %v1635_v40 = vor.u32 %v1993_v36, %v1634_v34  ;;  %v1682_v19 = vld [vmem:[#allocation10 + $0xa0] sm:$0xf]  ;;  %v1610_v36 = vld [vmem:[#allocation10 + $0x10] sm:$0xf] }
  0x41   :  { %377 = vmatpush.bf16.msra.mxu2 %v1483_v31  ;;  %390 = vmatpush.bf16.msra.mxu3 %v1487_v32  ;;  %v423_v52 = vmul.f32 %v2421_v35, %v422_v37  ;;  %v1698_v37 = vld [vmem:[#allocation10 + $0xc0] sm:$0xf]  ;;  %v1991_v58 = vld [vmem:[#allocation10 + $0x34] sm:$0xf0] }
  0x42   :  { %352 = vmatmul.bf16.vlgmr.msra.gmra.mxu0 %v183_v33  ;;  %v1627_v63 = vor.u32 %v1991_v58, %v1626_v57  ;;  %v2023_v4 = vld [vmem:[#allocation10 + $0x134] sm:$0xf0]  ;;  %v1746_v24 = vld [vmem:[#allocation10 + $0x120] sm:$0xf]  ;;  %v1985_v57 = vld [vmem:[#allocation10 + $0x4] sm:$0xf0] }
  0x43   :  { %365 = vmatmul.bf16.vlgmr.msra.gmra.mxu1 %v183_v33  ;;  %954 = vmatpush.bf16.msrb.mxu0 %v1659_v42  ;;  %v424_v5 = vadd.f32 %v2421_v35, %v423_v52  ;;  %v1762_v42 = vld [vmem:[#allocation10 + $0x140] sm:$0xf]  ;;  %v2041_v52 = vld [vmem:[#allocation10 + $0x1c4] sm:$0xf0] }
  0x44   :  { %378 = vmatmul.bf16.vlgmr.msra.gmra.mxu2 %v183_v33  ;;  %391 = vmatmul.bf16.vlgmr.msra.gmra.mxu3 %v183_v33  ;;  %v1835_v33 = vor.u32 %v2043_v30, %v1834_v25  ;;  %v2021_v25 = vld [vmem:[#allocation10 + $0x124] sm:$0xf0] }
  0x45   :  { %967 = vmatpush.bf16.msrb.mxu1 %v1723_v48  ;;  %980 = vmatpush.bf16.msrb.mxu2 %v1787_v49  ;;  %v2444_v26 = vsel %vm425_vm0, %v2421_v35, %v424_v5  ;;  %v2009_v35 = vld [vmem:[#allocation10 + $0xc4] sm:$0xf0]  ;;  %v1826_v48 = vld [vmem:[#allocation10 + $0x1c0] sm:$0xf]  ;;  %v1818_v5 = vld [vmem:[#allocation10 + $0x1b0] sm:$0xf]  ;;  %v1747_v30 = vor.u32 %v2021_v25, %v1746_v24 }
  0x46   :  { %993 = vmatpush.bf16.msrb.mxu3 %v1851_v54  ;;  %v1699_v45 = vor.u32 %v2009_v35, %v1698_v37  ;;  %v1827_v56 = vor.u32 %v2041_v52, %v1826_v48  ;;  %v1987_v37 = vld [vmem:[#allocation10 + $0x14] sm:$0xf0]  ;;  %v1674_v35 = vld [vmem:[#allocation10 + $0x90] sm:$0xf] }
  0x47   :  { %955 = vmatpush.bf16.msrb.mxu0 %v1651_v60 }
  0x49   :  { %968 = vmatpush.bf16.msrb.mxu1 %v1715_v1  ;;  %981 = vmatpush.bf16.msrb.mxu2 %v1779_v2  ;;  %v1754_v1 = vld [vmem:[#allocation10 + $0x130] sm:$0xf] }
  0x4a   :  { %994 = vmatpush.bf16.msrb.mxu3 %v1843_v7 }
  0x4b   :  { %956 = vmatpush.bf16.msrb.mxu0 %v1643_v17 }
  0x4d   :  { %969 = vmatpush.bf16.msrb.mxu1 %v1707_v23  ;;  %982 = vmatpush.bf16.msrb.mxu2 %v1771_v29 }
  0x4e   :  { %995 = vmatpush.bf16.msrb.mxu3 %v1835_v33 }
  0x4f   :  { %957 = vmatpush.bf16.msrb.mxu0 %v1635_v40  ;;  %v1611_v40 = vor.u32 %v1987_v37, %v1610_v36  ;;  %v1996_v37 = vld [vmem:[#allocation10 + $0x64] sm:$0xf] }
  0x51   :  { %970 = vmatpush.bf16.msrb.mxu1 %v1699_v45  ;;  %v2019_v45 = vld [vmem:[#allocation10 + $0x114] sm:$0xf0] }
  0x52   :  { %996 = vmatpush.bf16.msrb.mxu3 %v1827_v56  ;;  %v1602_v56 = vld [vmem:[#allocation10] sm:$0xf] }
  0x53   :  { %958 = vmatpush.bf16.msrb.mxu0 %v1627_v63 }
  0xbf   :  { %v2424_v41 = vpop.f32.mrf.mxu0 }
  0xc0   :  { %v396_v46 = vrot.slane %v2424_v41, 4  ;;  %v2427_v47 = vpop.f32.mrf.mxu1 }
  0xc1   :  { %v402_v53 = vrot.slane %v2427_v47, 4 }
  0xc2   :  { %v397_v55 = vadd.f32 %v396_v46, %v2424_v41  ;;  %v2025_v46 = vld [vmem:[#allocation10 + $0x144] sm:$0xf0] }
  0xc3   :  { %v403_v59 = vadd.f32 %v402_v53, %v2427_v47  ;;  %v1763_v51 = vor.u32 %v2025_v46, %v1762_v42  ;;  %v1802_v46 = vld [vmem:[#allocation10 + $0x190] sm:$0xf] }
  0xc4   :  { %v398_v0 = vrot.slane %v397_v55, 2 }
  0xc5   :  { %v404_v6 = vrot.slane %v403_v59, 2  ;;  %983 = vmatpush.bf16.msrb.mxu2 %v1763_v51  ;;  %v2035_v51 = vld [vmem:[#allocation10 + $0x194] sm:$0xf0] }
  0xc6   :  { %v399_v8 = vadd.f32 %v398_v0, %v397_v55  ;;  %v2007_v0 = vld [vmem:[#allocation10 + $0xb4] sm:$0xf0] }
  0xc7   :  { %v2435_v9 = vpop.f32.mrf.mxu2  ;;  %v405_v13 = vadd.f32 %v404_v6, %v403_v59  ;;  %v2438_v15 = vpop.f32.mrf.mxu3  ;;  %v1690_v59 = vld [vmem:[#allocation10 + $0xb0] sm:$0xf] }
  0xc8   :  { %v408_v14 = vrot.slane %v2435_v9, 4  ;;  %v355_v16 = vpop.f32.mrf.mxu0  ;;  %v400_v20 = vrot.slane %v399_v8, 1  ;;  %v414_v21 = vrot.slane %v2438_v15, 4  ;;  %v368_v22 = vpop.f32.mrf.mxu1  ;;  %v1691_v3 = vor.u32 %v2007_v0, %v1690_v59  ;;  %v1666_v0 = vld [vmem:[#allocation10 + $0x80] sm:$0xf] }
  0xc9   :  { %v406_v27 = vrot.slane %v405_v13, 1 }
  0xca   :  { %v409_v28 = vadd.f32 %v408_v14, %v2435_v9  ;;  %v401_v31 = vadd.f32 %v400_v20, %v399_v8  ;;  %v415_v32 = vadd.f32 %v414_v21, %v2438_v15  ;;  %v2039_v8 = vld [vmem:[#allocation10 + $0x1b4] sm:$0xf0]  ;;  %971 = vmatpush.bf16.msrb.mxu1 %v1691_v3  ;;  %v1989_v14 = vld [vmem:[#allocation10 + $0x24] sm:$0xf0] }
  0xcb   :  { %v407_v38 = vadd.f32 %v406_v27, %v405_v13  ;;  %v1819_v12 = vor.u32 %v2039_v8, %v1818_v5  ;;  %v1618_v13 = vld [vmem:[#allocation10 + $0x20] sm:$0xf]  ;;  %v2005_v20 = vld [vmem:[#allocation10 + $0xa4] sm:$0xf0] }
  0xcc   :  { %v410_v39 = vrot.slane %v409_v28, 2  ;;  %v427_v43 = vmul.f32 %v2444_v26, %v401_v31  ;;  %v416_v44 = vrot.slane %v415_v32, 2  ;;  %v1619_v18 = vor.u32 %v1989_v14, %v1618_v13  ;;  %v1810_v27 = vld [vmem:[#allocation10 + $0x1a0] sm:$0xf]  ;;  %v2037_v31 = vld [vmem:[#allocation10 + $0x1a4] sm:$0xf0] }
  0xcd   :  { %v428_v49 = vmul.f32 %v2444_v26, %v407_v38  ;;  %997 = vmatpush.bf16.msrb.mxu3 %v1819_v12  ;;  %v1683_v23 = vor.u32 %v2005_v20, %v1682_v19  ;;  %v1811_v34 = vor.u32 %v2037_v31, %v1810_v27  ;;  %v2017_v5 = vld [vmem:[#allocation10 + $0x104] sm:$0xf0]  ;;  %v1794_v8 = vld [vmem:[#allocation10 + $0x180] sm:$0xf]  ;;  %v1998_v14 = vld [vmem:[#allocation10 + $0x74] sm:$0xf] }
  0xce   :  { %v411_v50 = vadd.f32 %v410_v39, %v409_v28  ;;  %v2451_v53 = vsub.f32 %v2424_v41, %v427_v43  ;;  %v417_v54 = vadd.f32 %v416_v44, %v415_v32  ;;  %959 = vmatpush.bf16.msrb.mxu0 %v1619_v18  ;;  %v1788_v27 = vld [vmem:[#allocation10 + $0x178] sm:$0xf0]  ;;  %v2046_v31 = vld [vmem:[#allocation10 + $0x1f4] sm:$0xf] }
  0xcf   :  { %v381_v55 = vpop.f32.mrf.mxu2  ;;  %v2454_v60 = vsub.f32 %v2427_v47, %v428_v49  ;;  %v394_v62 = vpop.f32.mrf.mxu3  ;;  %v1755_v47 = vor.u32 %v2023_v4, %v1754_v1  ;;  %972 = vmatpush.bf16.msrb.mxu1 %v1683_v23  ;;  %v2001_v1 = vld [vmem:[#allocation10 + $0x84] sm:$0xf0]  ;;  %v1730_v4 = vld [vmem:[#allocation10 + $0x100] sm:$0xf] }
  0xd0   :  { %v412_v61 = vrot.slane %v411_v50, 1  ;;  %v435_v41 = vmul.f32 %v2451_v53, %v2451_v53  ;;  %v418_v2 = vrot.slane %v417_v54, 1  ;;  %v1803_v55 = vor.u32 %v2035_v51, %v1802_v46  ;;  %v1844_v46 = vld [vmem:[#allocation10 + $0x1e8] sm:$0xf0]  ;;  %v1994_v51 = vld [vmem:[#allocation10 + $0x54] sm:$0xf] }
  0xd1   :  { %v436_v6 = vmul.f32 %v2454_v60, %v2454_v60  ;;  %984 = vmatpush.bf16.msrb.mxu2 %v1755_v47  ;;  %998 = vmatpush.bf16.msrb.mxu3 %v1811_v34  ;;  %v1667_v3 = vor.u32 %v2001_v1, %v1666_v0  ;;  %v1731_v47 = vor.u32 %v2017_v5, %v1730_v4  ;;  %v2042_v0 = vld [vmem:[#allocation10 + $0x1d4] sm:$0xf]  ;;  %v1636_v4 = vld [vmem:[#allocation10 + $0x48] sm:$0xf0] }
  0xd2   :  { %v413_v7 = vadd.f32 %v412_v61, %v411_v50  ;;  %v439_v10 = vrot.slane %v435_v41, 4  ;;  %v419_v11 = vadd.f32 %v418_v2, %v417_v54  ;;  %960 = vmatpush.bf16.msrb.mxu0 %v1611_v40  ;;  %v1603_v61 = vor.u32 %v1985_v57, %v1602_v56  ;;  %v1708_v57 = vld [vmem:[#allocation10 + $0xd8] sm:$0xf0] }
  0xd3   :  { %v445_v16 = vrot.slane %v436_v6, 4 }
  0xd4   :  { %v429_v17 = vmul.f32 %v2444_v26, %v413_v7  ;;  %v440_v21 = vadd.f32 %v439_v10, %v435_v41  ;;  %v430_v22 = vmul.f32 %v2444_v26, %v419_v11  ;;  %v2033_v10 = vld [vmem:[#allocation10 + $0x184] sm:$0xf0] }
  0xd5   :  { %v446_v28 = vadd.f32 %v445_v16, %v436_v6  ;;  %985 = vmatpush.bf16.msrb.mxu2 %v1747_v30  ;;  %999 = vmatpush.bf16.msrb.mxu3 %v1803_v55  ;;  %v1795_v13 = vor.u32 %v2033_v10, %v1794_v8  ;;  %v1660_v16 = vld [vmem:[#allocation10 + $0x78] sm:$0xf0] }
  0xd6   :  { %v2463_v29 = vsub.f32 %v2435_v9, %v429_v17  ;;  %v441_v32 = vrot.slane %v440_v21, 2  ;;  %v2466_v33 = vsub.f32 %v2438_v15, %v430_v22  ;;  %v2003_v9 = vld [vmem:[#allocation10 + $0x94] sm:$0xf0]  ;;  %v1738_v15 = vld [vmem:[#allocation10 + $0x110] sm:$0xf]  ;;  %961 = vmatpush.bf16.msrb.mxu0 %v1603_v61  ;;  %v1663_v20 = vor.u32 %v1998_v14, %v1660_v16 }
  0xd7   :  { %v447_v38 = vrot.slane %v446_v28, 2  ;;  %v1675_v44 = vor.u32 %v2003_v9, %v1674_v35  ;;  %v1739_v50 = vor.u32 %v2019_v45, %v1738_v15  ;;  %v2014_v17 = vld [vmem:[#allocation10 + $0xf4] sm:$0xf]  ;;  %v1716_v9 = vld [vmem:[#allocation10 + $0xe8] sm:$0xf0] }
  0xd8   :  { %v437_v39 = vmul.f32 %v2463_v29, %v2463_v29  ;;  %v442_v42 = vadd.f32 %v441_v32, %v440_v21  ;;  %v438_v43 = vmul.f32 %v2466_v33, %v2466_v33  ;;  %v1724_v21 = vld [vmem:[#allocation10 + $0xf8] sm:$0xf0]  ;;  %v2030_v22 = vld [vmem:[#allocation10 + $0x174] sm:$0xf]  ;;  %v1780_v15 = vld [vmem:[#allocation10 + $0x168] sm:$0xf0] }
  0xd9   :  { %v448_v48 = vadd.f32 %v447_v38, %v446_v28  ;;  %973 = vmatpush.bf16.msrb.mxu1 %v1675_v44  ;;  %986 = vmatpush.bf16.msrb.mxu2 %v1739_v50  ;;  %v1727_v25 = vor.u32 %v2014_v17, %v1724_v21  ;;  %v1791_v30 = vor.u32 %v2030_v22, %v1788_v27  ;;  %v1852_v32 = vld [vmem:[#allocation10 + $0x1f8] sm:$0xf0]  ;;  %v1652_v38 = vld [vmem:[#allocation10 + $0x68] sm:$0xf0]  ;;  %v2044_v45 = vld [vmem:[#allocation10 + $0x1e4] sm:$0xf] }
  0xda   :  { %v451_v49 = vrot.slane %v437_v39, 4  ;;  %v443_v52 = vrot.slane %v442_v42, 1  ;;  %v457_v54 = vrot.slane %v438_v43, 4  ;;  %1000 = vmatpush.bf16.msrb.mxu3 %v1795_v13  ;;  %1006 = vmatpush.bf16.msra.mxu0 %v1663_v20  ;;  %v1855_v36 = vor.u32 %v2046_v31, %v1852_v32  ;;  %v2040_v17 = vld [vmem:[#allocation10 + $0x1c4] sm:$0xf] }
  0xdb   :  { %v449_v58 = vrot.slane %v448_v48, 1  ;;  %v1655_v35 = vor.u32 %v1996_v37, %v1652_v38  ;;  %v1847_v50 = vor.u32 %v2044_v45, %v1844_v46  ;;  %v1990_v22 = vld [vmem:[#allocation10 + $0x34] sm:$0xf]  ;;  %v1620_v45 = vld [vmem:[#allocation10 + $0x28] sm:$0xf0] }
  0xdc   :  { %v452_v59 = vadd.f32 %v451_v49, %v437_v39  ;;  %v444_v62 = vadd.f32 %v443_v52, %v442_v42  ;;  %v458_v63 = vadd.f32 %v457_v54, %v438_v43  ;;  %v2012_v39 = vld [vmem:[#allocation10 + $0xe4] sm:$0xf]  ;;  %v1644_v52 = vld [vmem:[#allocation10 + $0x58] sm:$0xf0]  ;;  %v2010_v54 = vld [vmem:[#allocation10 + $0xd4] sm:$0xf] }
  0xdd   :  { %v450_v41 = vadd.f32 %v449_v58, %v448_v48  ;;  %974 = vmatpush.bf16.msrb.mxu1 %v1667_v3  ;;  %987 = vmatpush.bf16.msrb.mxu2 %v1731_v47  ;;  %v2028_v42 = vld [vmem:[#allocation10 + $0x164] sm:$0xf]  ;;  %v1719_v44 = vor.u32 %v2012_v39, %v1716_v9  ;;  %v1647_v56 = vor.u32 %v1994_v51, %v1644_v52  ;;  %v2026_v58 = vld [vmem:[#allocation10 + $0x154] sm:$0xf]  ;;  %v1820_v9 = vld [vmem:[#allocation10 + $0x1b8] sm:$0xf0] }
  0xde   :  { %v453_v2 = vrot.slane %v452_v59, 2  ;;  %v463_v6 = vmul.f32 %v444_v62, %v2444_v26  ;;  %v459_v7 = vrot.slane %v458_v63, 2  ;;  %1045 = vmatpush.bf16.msra.mxu3 %v1855_v36  ;;  %1007 = vmatpush.bf16.msra.mxu0 %v1655_v35  ;;  %v1783_v49 = vor.u32 %v2028_v42, %v1780_v15  ;;  %v1992_v3 = vld [vmem:[#allocation10 + $0x44] sm:$0xf]  ;;  %v1756_v36 = vld [vmem:[#allocation10 + $0x138] sm:$0xf0] }
  0xdf   :  { %v464_v11 = vmul.f32 %v450_v41, %v2444_v26  ;;  %v1711_v62 = vor.u32 %v2010_v54, %v1708_v57  ;;  %v1639_v10 = vor.u32 %v1992_v3, %v1636_v4  ;;  %v2038_v35 = vld [vmem:[#allocation10 + $0x1b4] sm:$0xf]  ;;  %v1988_v15 = vld [vmem:[#allocation10 + $0x24] sm:$0xf]  ;;  %v1684_v51 = vld [vmem:[#allocation10 + $0xa8] sm:$0xf0] }
  0xe0   :  { %v454_v12 = vadd.f32 %v453_v2, %v452_v59  ;;  %v2474_v18 = vadd.f32 1e-05, %v463_v6  ;;  %v460_v19 = vadd.f32 %v459_v7, %v458_v63  ;;  %v1772_v63 = vld [vmem:[#allocation10 + $0x158] sm:$0xf0]  ;;  %v2008_v6 = vld [vmem:[#allocation10 + $0xc4] sm:$0xf] }
  0xe1   :  { %v2476_v23 = vadd.f32 1e-05, %v464_v11  ;;  %1019 = vmatpush.bf16.msra.mxu1 %v1727_v25  ;;  %1032 = vmatpush.bf16.msra.mxu2 %v1791_v30  ;;  %v1836_v2 = vld [vmem:[#allocation10 + $0x1d8] sm:$0xf0]  ;;  %v1700_v7 = vld [vmem:[#allocation10 + $0xc8] sm:$0xf0]  ;;  %v1775_v47 = vor.u32 %v2026_v58, %v1772_v63 }
  0xe2   :  { %v455_v24 = vrot.slane %v454_v12, 1  ;;  %2091 = vrsqrt.f32 %v2474_v18  ;;  %v461_v28 = vrot.slane %v460_v19, 1  ;;  %1046 = vmatpush.bf16.msra.mxu3 %v1847_v50  ;;  %1008 = vmatpush.bf16.msra.mxu0 %v1647_v56  ;;  %v1839_v8 = vor.u32 %v2042_v0, %v1836_v2  ;;  %v2024_v11 = vld [vmem:[#allocation10 + $0x144] sm:$0xf]  ;;  %v1692_v30 = vld [vmem:[#allocation10 + $0xb8] sm:$0xf0] }
  0xe3   :  { %2093 = vrsqrt.f32 %v2476_v23  ;;  %v1703_v16 = vor.u32 %v2008_v6, %v1700_v7  ;;  %vm487_vm2 = vweird.f32 %v2476_v23  ;;  %v2004_v50 = vld [vmem:[#allocation10 + $0xa4] sm:$0xf]  ;;  %v1748_v57 = vld [vmem:[#allocation10 + $0x128] sm:$0xf0]  ;;  %v1986_v2 = vld [vmem:[#allocation10 + $0x14] sm:$0xf]  ;;  %vm477_vm13 = vweird.f32 %v2474_v18 }
  0xe4   :  { %v456_v34 = vadd.f32 %v455_v24, %v454_v12  ;;  %v462_v40 = vadd.f32 %v461_v28, %v460_v19  ;;  %v1764_v12 = vld [vmem:[#allocation10 + $0x148] sm:$0xf0]  ;;  %v1628_v24 = vld [vmem:[#allocation10 + $0x38] sm:$0xf0]  ;;  %v2006_v28 = vld [vmem:[#allocation10 + $0xb4] sm:$0xf]  ;;  %v1687_v54 = vor.u32 %v2004_v50, %v1684_v51 }
  0xe5   :  { %1020 = vmatpush.bf16.msra.mxu1 %v1719_v44  ;;  %1033 = vmatpush.bf16.msra.mxu2 %v1783_v49  ;;  %v1828_v19 = vld [vmem:[#allocation10 + $0x1c8] sm:$0xf0]  ;;  %v1767_v20 = vor.u32 %v2024_v11, %v1764_v12  ;;  %v1631_v27 = vor.u32 %v1990_v22, %v1628_v24  ;;  %v1695_v32 = vor.u32 %v2006_v28, %v1692_v30  ;;  %v2020_v56 = vld [vmem:[#allocation10 + $0x124] sm:$0xf]  ;;  %v1612_v6 = vld [vmem:[#allocation10 + $0x18] sm:$0xf0] }
  0xe6   :  { %v465_v43 = vmul.f32 %v456_v34, %v2444_v26  ;;  %v466_v48 = vmul.f32 %v462_v40, %v2444_v26  ;;  %1047 = vmatpush.bf16.msra.mxu3 %v1839_v8  ;;  %v1831_v21 = vor.u32 %v2040_v17, %v1828_v19  ;;  %1009 = vmatpush.bf16.msra.mxu0 %v1639_v10  ;;  %v2022_v34 = vld [vmem:[#allocation10 + $0x134] sm:$0xf]  ;;  %v2036_v58 = vld [vmem:[#allocation10 + $0x1a4] sm:$0xf]  ;;  %v1604_v22 = vld [vmem:[#allocation10 + $0x8] sm:$0xf0] }
  0xe7   :  { %v1823_v44 = vor.u32 %v2038_v35, %v1820_v9  ;;  %v1751_v4 = vor.u32 %v2020_v56, %v1748_v57  ;;  %v2002_v7 = vld [vmem:[#allocation10 + $0x94] sm:$0xf]  ;;  %v2000_v28 = vld [vmem:[#allocation10 + $0x84] sm:$0xf]  ;;  %v1668_v30 = vld [vmem:[#allocation10 + $0x88] sm:$0xf0] }
  0xe8   :  { %v2482_v55 = vadd.f32 1e-05, %v465_v43  ;;  %v2484_v59 = vpop.eup %2091  ;;  %v2486_v61 = vadd.f32 1e-05, %v466_v48  ;;  %v1759_v43 = vor.u32 %v2022_v34, %v1756_v36  ;;  %v2018_v10 = vld [vmem:[#allocation10 + $0x114] sm:$0xf] }
  0xe9   :  { %v2488_v1 = vpop.eup %2093  ;;  %v472_v41 = vmul.f32 %v2484_v59, %v2474_v18  ;;  %1021 = vmatpush.bf16.msra.mxu1 %v1711_v62  ;;  %1034 = vmatpush.bf16.msra.mxu2 %v1775_v47  ;;  %v2034_v17 = vld [vmem:[#allocation10 + $0x194] sm:$0xf]  ;;  %vm478_vm12 = vweird.f32 %v2484_v59  ;;  %v182_v18 = vld [vmem:[#allocation8] sm:$0xf] }
  0xea   :  { %2095 = vrsqrt.f32 %v2482_v55  ;;  %v482_v5 = vmul.f32 %v2488_v1, %v2476_v23  ;;  %vm488_vm1 = vweird.f32 %v2488_v1  ;;  %1048 = vmatpush.bf16.msra.mxu3 %v1831_v21  ;;  %1010 = vmatpush.bf16.msra.mxu0 %v1631_v27  ;;  %v1623_v23 = vor.u32 %v1988_v15, %v1620_v45  ;;  %v1984_v21 = vld [vmem:[#allocation10 + $0x4] sm:$0xf]  ;;  %vm479_vm14 = vmor %vm477_vm13, %vm478_vm12 }
  0xeb   :  { %2097 = vrsqrt.f32 %v2486_v61  ;;  %v473_v13 = vmul.f32 %v2484_v59, %v472_v41  ;;  %vm2511_vm3 = vmor %vm487_vm2, %vm488_vm1  ;;  %v1812_v41 = vld [vmem:[#allocation10 + $0x1a8] sm:$0xf0]  ;;  %vm497_vm7 = vweird.f32 %v2482_v55  ;;  %vm507_vm9 = vweird.f32 %v2486_v61 }
  0xec   :  { %v483_v14 = vmul.f32 %v2488_v1, %v482_v5  ;;  %v1815_v5 = vor.u32 %v2036_v58, %v1812_v41  ;;  %v1607_v36 = vor.u32 %v1984_v21, %v1604_v22  ;;  %v540_v50 = vperm.slane %v182_v18, 0 }
  0xed   :  { %1022 = vmatpush.bf16.msra.mxu1 %v1703_v16  ;;  %v474_v38 = vmul.f32 0.5, %v473_v13  ;;  %1035 = vmatpush.bf16.msra.mxu2 %v1767_v20  ;;  %v1740_v16 = vld [vmem:[#allocation10 + $0x118] sm:$0xf0]  ;;  %v541_v51 = vperm.slane %v182_v18, 1 }
  0xee   :  { %v484_v25 = vmul.f32 0.5, %v483_v14  ;;  %1049 = vmatpush.bf16.msra.mxu3 %v1823_v44  ;;  %1011 = vmatpush.bf16.msra.mxu0 %v1623_v23  ;;  %v1804_v20 = vld [vmem:[#allocation10 + $0x198] sm:$0xf0]  ;;  %v543_v23 = vperm.slane %v182_v18, 3 }
  0xef   :  { %v475_v62 = vsub.f32 1.5, %v474_v38  ;;  %v1807_v27 = vor.u32 %v2034_v17, %v1804_v20  ;;  %v1732_v38 = vld [vmem:[#allocation10 + $0x108] sm:$0xf0] }
  0xf0   :  { %v2498_v31 = vpop.eup %2095  ;;  %v485_v39 = vsub.f32 1.5, %v484_v25  ;;  %v1743_v25 = vor.u32 %v2018_v10, %v1740_v16 }
  0xf1   :  { %v2501_v37 = vpop.eup %2097  ;;  %v492_v40 = vmul.f32 %v2498_v31, %v2482_v55  ;;  %vm498_vm4 = vweird.f32 %v2498_v31  ;;  %1023 = vmatpush.bf16.msra.mxu1 %v1695_v32  ;;  %1036 = vmatpush.bf16.msra.mxu2 %v1759_v43  ;;  %v1676_v55 = vld [vmem:[#allocation10 + $0x98] sm:$0xf0]  ;;  %v476_v19 = vmul.f32 %v2484_v59, %v475_v62  ;;  %v2016_v32 = vld [vmem:[#allocation10 + $0x104] sm:$0xf] }
  0xf2   :  { %v502_v42 = vmul.f32 %v2501_v37, %v2486_v61  ;;  %v486_v46 = vmul.f32 %v2488_v1, %v485_v39  ;;  %vm508_vm6 = vweird.f32 %v2501_v37  ;;  %vm2525_vm8 = vmor %vm497_vm7, %vm498_vm4  ;;  %v1679_v14 = vor.u32 %v2002_v7, %v1676_v55  ;;  %1050 = vmatpush.bf16.msra.mxu3 %v1815_v5  ;;  %v2032_v39 = vld [vmem:[#allocation10 + $0x184] sm:$0xf] }
  0xf3   :  { %v493_v49 = vmul.f32 %v2498_v31, %v492_v40  ;;  %vm2532_vm11 = vmor %vm507_vm9, %vm508_vm6  ;;  %v1796_v40 = vld [vmem:[#allocation10 + $0x188] sm:$0xf0]  ;;  %v480_v44 = vsel %vm479_vm14, %v2484_v59, %v476_v19  ;;  %v1735_v15 = vor.u32 %v2016_v32, %v1732_v38 }
  0xf4   :  { %v503_v52 = vmul.f32 %v2501_v37, %v502_v42  ;;  %v490_v63 = vsel %vm2511_vm3, %v2488_v1, %v486_v46  ;;  %v1615_v1 = vor.u32 %v1986_v2, %v1612_v6  ;;  %v1671_v42 = vor.u32 %v2000_v28, %v1668_v30 }
  0xf5   :  { %v494_v0 = vmul.f32 0.5, %v493_v49  ;;  %v515_v11 = vrot.slane %v490_v63, 7  ;;  %1024 = vmatpush.bf16.msra.mxu1 %v1687_v54  ;;  %1037 = vmatpush.bf16.msra.mxu2 %v1751_v4  ;;  %v1799_v45 = vor.u32 %v2032_v39, %v1796_v40 }
  0xf6   :  { %v504_v3 = vmul.f32 0.5, %v503_v52  ;;  %1012 = vmatpush.bf16.msra.mxu0 %v1615_v1  ;;  %1051 = vmatpush.bf16.msra.mxu3 %v1807_v27  ;;  %v542_v52 = vperm.slane %v182_v18, 2 }
  0xf7   :  { %v495_v47 = vsub.f32 1.5, %v494_v0  ;;  %v519_v46 = vsel %vm518_vm5, %v480_v44, %v515_v11 }
  0xf8   :  { %v505_v12 = vsub.f32 1.5, %v504_v3 }
  0xf9   :  { %v496_v61 = vmul.f32 %v2498_v31, %v495_v47  ;;  %1025 = vmatpush.bf16.msra.mxu1 %v1679_v14  ;;  %1038 = vmatpush.bf16.msra.mxu2 %v1743_v25 }
  0xfa   :  { %v506_v24 = vmul.f32 %v2501_v37, %v505_v12  ;;  %1013 = vmatpush.bf16.msra.mxu0 %v1607_v36  ;;  %1052 = vmatpush.bf16.msra.mxu3 %v1799_v45 }
  0xfb   :  { %v500_v34 = vsel %vm2525_vm8, %v2498_v31, %v496_v61  ;;  %v181_v31 = vld [vmem:[#allocation7] sm:$0xf] }
  0xfc   :  { %v516_v35 = vrot.slane %v500_v34, 6  ;;  %v510_v9 = vsel %vm2532_vm11, %v2501_v37, %v506_v24 }
  0xfd   :  { %v517_v43 = vrot.slane %v510_v9, 5  ;;  %1026 = vmatpush.bf16.msra.mxu1 %v1671_v42  ;;  %1039 = vmatpush.bf16.msra.mxu2 %v1735_v15 }
  0xff   :  { %v521_v48 = vsel %vm520_vm10, %v516_v35, %v517_v43 }
 0x100   :  { %v523_v37 = vsel %vm522_vm15, %v519_v46, %v521_v48 }
 0x101   :  { %v525_v49 = vmul.f32 %v523_v37, %v181_v31 }
 0x103   :  { %v530_v59 = vperm.slane %v525_v49, 3  ;;  %v527_v54 = vperm.slane %v525_v49, 0  ;;  %v528_v56 = vperm.slane %v525_v49, 1  ;;  %v529_v57 = vperm.slane %v525_v49, 2  ;;  %v2055_v49 = vld [vmem:[#allocation11 + $0x38] sm:$0xff] }
 0x105   :  { %v538_v58 = vmul.f32 %v530_v59, %v2466_v33  ;;  %v535_v62 = vmul.f32 %v527_v54, %v2451_v53  ;;  %v536_v63 = vmul.f32 %v528_v56, %v2454_v60  ;;  %v537_v0 = vmul.f32 %v529_v57, %v2463_v29  ;;  %v2054_v54 = vld [vmem:[#allocation11 + $0x30] sm:$0xff] }
 0x106   :  { %v2062_v56 = vld [vmem:[#allocation11 + $0x70] sm:$0xff] }
 0x107   :  { %v551_v41 = vadd.f32 %v543_v23, %v538_v58  ;;  %v548_v2 = vadd.f32 %v540_v50, %v535_v62  ;;  %v549_v3 = vadd.f32 %v541_v51, %v536_v63  ;;  %v550_v4 = vadd.f32 %v542_v52, %v537_v0  ;;  %v2063_v23 = vld [vmem:[#allocation11 + $0x78] sm:$0xff]  ;;  %v2053_v0 = vld [vmem:[#allocation11 + $0x28] sm:$0xff] }
 0x109   :  { %vm552_vm0 = vcmp.ge.f32.partialorder %v548_v2, 0.0  ;;  %v556_v5 = vmul.f32 0.2, %v548_v2  ;;  %vm553_vm1 = vcmp.ge.f32.partialorder %v549_v3, 0.0  ;;  %v557_v6 = vmul.f32 0.2, %v549_v3 }
 0x10a   :  { %vm554_vm2 = vcmp.ge.f32.partialorder %v550_v4, 0.0  ;;  %v558_v7 = vmul.f32 0.2, %v550_v4  ;;  %vm555_vm3 = vcmp.ge.f32.partialorder %v551_v41, 0.0  ;;  %v559_v47 = vmul.f32 0.2, %v551_v41 }
 0x10b   :  { %v560_v8 = vsel %vm552_vm0, %v548_v2, %v556_v5  ;;  %v561_v33 = vsel %vm553_vm1, %v549_v3, %v557_v6  ;;  %v2052_v5 = vld [vmem:[#allocation11 + $0x20] sm:$0xff] }
 0x10c   :  { %v630_v1 = vpack.c.bf16 %v560_v8, %v560_v8  ;;  %v631_v53 = vpack.c.bf16 %v561_v33, %v561_v33  ;;  %v562_v55 = vsel %vm554_vm2, %v550_v4, %v558_v7  ;;  %v563_v60 = vsel %vm555_vm3, %v551_v41, %v559_v47  ;;  %v2061_v41 = vld [vmem:[#allocation11 + $0x68] sm:$0xff]  ;;  %v2060_v6 = vld [vmem:[#allocation11 + $0x60] sm:$0xff]  ;;  %v2051_v33 = vld [vmem:[#allocation11 + $0x18] sm:$0xff] }
 0x10d   :  { %v632_v10 = vpack.c.bf16 %v562_v55, %v562_v55  ;;  %v633_v29 = vpack.c.bf16 %v563_v60, %v563_v60 }
 0x10e   :  { %962 = vmatmul.bf16.vlgmr.msrb.gmra.mxu0 %v630_v1  ;;  %975 = vmatmul.bf16.vlgmr.msrb.gmra.mxu1 %v631_v53 }
 0x10f   :  { %988 = vmatmul.bf16.vlgmr.msrb.gmra.mxu2 %v632_v10  ;;  %1001 = vmatmul.bf16.vlgmr.msrb.gmra.mxu3 %v633_v29 }
 0x110   :  { %1270 = vmatpush.bf16.msrb.mxu0 %v2055_v49  ;;  %1283 = vmatpush.bf16.msrb.mxu1 %v2063_v23 }
 0x114   :  { %1271 = vmatpush.bf16.msrb.mxu0 %v2054_v54  ;;  %1284 = vmatpush.bf16.msrb.mxu1 %v2062_v56 }
 0x118   :  { %1272 = vmatpush.bf16.msrb.mxu0 %v2053_v0  ;;  %1285 = vmatpush.bf16.msrb.mxu1 %v2061_v41 }
 0x11c   :  { %1273 = vmatpush.bf16.msrb.mxu0 %v2052_v5  ;;  %1286 = vmatpush.bf16.msrb.mxu1 %v2060_v6  ;;  %v2069_v6 = vld [vmem:[#allocation13 + $0x28] sm:$0xff] }
 0x11e   :  { %1014 = vmatmul.bf16.vlgmr.msra.gmra.mxu0 %v630_v1  ;;  %1027 = vmatmul.bf16.vlgmr.msra.gmra.mxu1 %v631_v53  ;;  %v2059_v1 = vld [vmem:[#allocation11 + $0x58] sm:$0xff] }
 0x11f   :  { %1040 = vmatmul.bf16.vlgmr.msra.gmra.mxu2 %v632_v10  ;;  %1053 = vmatmul.bf16.vlgmr.msra.gmra.mxu3 %v633_v29  ;;  %v2050_v10 = vld [vmem:[#allocation11 + $0x10] sm:$0xff] }
 0x120   :  { %1274 = vmatpush.bf16.msrb.mxu0 %v2051_v33  ;;  %1287 = vmatpush.bf16.msrb.mxu1 %v2059_v1  ;;  %v2058_v29 = vld [vmem:[#allocation11 + $0x50] sm:$0xff] }
 0x124   :  { %1275 = vmatpush.bf16.msrb.mxu0 %v2050_v10  ;;  %1288 = vmatpush.bf16.msrb.mxu1 %v2058_v29  ;;  %v2066_v10 = vld [vmem:[#allocation13 + $0x10] sm:$0xff] }
 0x18b   :  { %v963_v11 = vpop.f32.mrf.mxu0  ;;  %v976_v12 = vpop.f32.mrf.mxu1 }
 0x18c   :  { %v977_v13 = vadd.f32 %v976_v12, %v963_v11 }
 0x192   :  { %v989_v14 = vpop.f32.mrf.mxu2  ;;  %v1002_v16 = vpop.f32.mrf.mxu3 }
 0x193   :  { %v990_v17 = vadd.f32 %v989_v14, %v977_v13  ;;  %v965_v19 = vpop.f32.mrf.mxu0  ;;  %v978_v61 = vpop.f32.mrf.mxu1  ;;  %v2049_v13 = vld [vmem:[#allocation11 + $0x8] sm:$0xff] }
 0x194   :  { %v2057_v14 = vld [vmem:[#allocation11 + $0x48] sm:$0xff]  ;;  %1276 = vmatpush.bf16.msrb.mxu0 %v2049_v13  ;;  %v2056_v19 = vld [vmem:[#allocation11 + $0x40] sm:$0xff] }
 0x195   :  { %v1003_v20 = vadd.f32 %v1002_v16, %v990_v17  ;;  %1289 = vmatpush.bf16.msrb.mxu1 %v2057_v14  ;;  %v2048_v17 = vld [vmem:[#allocation11] sm:$0xff] }
 0x197   :  { %v1058_v21 = vrot.slane %v1003_v20, 4 }
 0x198   :  { %1277 = vmatpush.bf16.msrb.mxu0 %v2048_v17 }
 0x199   :  { %v1059_v22 = vadd.f32 %v1058_v21, %v1003_v20  ;;  %1290 = vmatpush.bf16.msrb.mxu1 %v2056_v19 }
 0x19a   :  { %v991_v24 = vpop.f32.mrf.mxu2  ;;  %v1004_v25 = vpop.f32.mrf.mxu3 }
 0x19b   :  { %v1060_v27 = vrot.slane %v1059_v22, 2  ;;  %v1015_v28 = vpop.f32.mrf.mxu0  ;;  %v1028_v30 = vpop.f32.mrf.mxu1 }
 0x19c   :  { %v1029_v38 = vadd.f32 %v1028_v30, %v1015_v28 }
 0x19d   :  { %v1061_v32 = vadd.f32 %v1060_v27, %v1059_v22 }
 0x19f   :  { %v1062_v34 = vrot.slane %v1061_v32, 1 }
 0x1a1   :  { %v1063_v36 = vadd.f32 %v1062_v34, %v1061_v32 }
 0x1a2   :  { %v1041_v39 = vpop.f32.mrf.mxu2  ;;  %v1054_v40 = vpop.f32.mrf.mxu3 }
 0x1a3   :  { %v1070_v35 = vmul.f32 %v1063_v36, %v2444_v26  ;;  %v1042_v9 = vadd.f32 %v1041_v39, %v1029_v38  ;;  %v1017_v42 = vpop.f32.mrf.mxu0  ;;  %v1030_v43 = vpop.f32.mrf.mxu1 }
 0x1a4   :  { %v629_v43 = vld [vmem:[%s2602_s6] sm:$0x3] }
 0x1a5   :  { %v2557_v31 = vsub.f32 %v1003_v20, %v1070_v35  ;;  %v1055_v44 = vadd.f32 %v1054_v40, %v1042_v9  ;;  %v628_v35 = vld [vmem:[%s2601_s5] sm:$0x3] }
 0x1a7   :  { %v1074_v15 = vmul.f32 %v2557_v31, %v2557_v31  ;;  %v1064_v45 = vrot.slane %v1055_v44, 4 }
 0x1a9   :  { %v1076_v18 = vrot.slane %v1074_v15, 4  ;;  %v1065_v46 = vadd.f32 %v1064_v45, %v1055_v44 }
 0x1aa   :  { %v1043_v48 = vpop.f32.mrf.mxu2  ;;  %v1056_v37 = vpop.f32.mrf.mxu3 }
 0x1ab   :  { %v1077_v50 = vadd.f32 %v1076_v18, %v1074_v15  ;;  %v1066_v51 = vrot.slane %v1065_v46, 2  ;;  %v1127_v48 = vperm.slane %v629_v43, 1 }
 0x1ad   :  { %v1078_v52 = vrot.slane %v1077_v50, 2  ;;  %v1067_v59 = vadd.f32 %v1066_v51, %v1065_v46  ;;  %v1126_v46 = vperm.slane %v629_v43, 0 }
 0x1af   :  { %v1079_v57 = vadd.f32 %v1078_v52, %v1077_v50  ;;  %v1068_v58 = vrot.slane %v1067_v59, 1 }
 0x1b1   :  { %v1080_v62 = vrot.slane %v1079_v57, 1  ;;  %v1069_v63 = vadd.f32 %v1068_v58, %v1067_v59 }
 0x1b3   :  { %v1081_v2 = vadd.f32 %v1080_v62, %v1079_v57  ;;  %v1071_v3 = vmul.f32 %v1069_v63, %v2444_v26  ;;  %v2071_v63 = vld [vmem:[#allocation13 + $0x38] sm:$0xff] }
 0x1b4   :  { %1399 = vmatpush.bf16.msrb.mxu2 %v2071_v63 }
 0x1b5   :  { %v2562_v4 = vsub.f32 %v1055_v44, %v1071_v3  ;;  %v1088_v7 = vmul.f32 %v1081_v2, %v2444_v26  ;;  %v2070_v2 = vld [vmem:[#allocation13 + $0x30] sm:$0xff] }
 0x1b7   :  { %v1075_v47 = vmul.f32 %v2562_v4, %v2562_v4  ;;  %v1090_v53 = vadd.f32 1e-05, %v1088_v7 }
 0x1b8   :  { %1400 = vmatpush.bf16.msrb.mxu2 %v2070_v2  ;;  %v1348_v2 = vld [vmem:[%s2607_s11] sm:$0x1] }
 0x1b9   :  { %v1082_v8 = vrot.slane %v1075_v47, 4  ;;  %2099 = vrsqrt.f32 %v1090_v53  ;;  %vm1098_vm9 = vweird.f32 %v1090_v53 }
 0x1bb   :  { %v1083_v55 = vadd.f32 %v1082_v8, %v1075_v47  ;;  %v2068_v8 = vld [vmem:[#allocation13 + $0x20] sm:$0xff] }
 0x1bc   :  { %1401 = vmatpush.bf16.msrb.mxu2 %v2069_v6 }
 0x1bd   :  { %v1084_v60 = vrot.slane %v1083_v55, 2 }
 0x1bf   :  { %v1085_v11 = vadd.f32 %v1084_v60, %v1083_v55  ;;  %v2100_v61 = vpop.eup %2099 }
 0x1c0   :  { %v1093_v22 = vmul.f32 %v2100_v61, %v1090_v53  ;;  %vm1099_vm6 = vweird.f32 %v2100_v61  ;;  %1402 = vmatpush.bf16.msrb.mxu2 %v2068_v8  ;;  %v2067_v53 = vld [vmem:[#allocation13 + $0x18] sm:$0xff] }
 0x1c1   :  { %v1086_v12 = vrot.slane %v1085_v11, 1  ;;  %vm1100_vm10 = vmor %vm1098_vm9, %vm1099_vm6 }
 0x1c2   :  { %v1094_v24 = vmul.f32 %v2100_v61, %v1093_v22 }
 0x1c3   :  { %v1087_v16 = vadd.f32 %v1086_v12, %v1085_v11  ;;  %v2065_v12 = vld [vmem:[#allocation13 + $0x8] sm:$0xff] }
 0x1c4   :  { %v1095_v27 = vmul.f32 0.5, %v1094_v24  ;;  %1403 = vmatpush.bf16.msrb.mxu2 %v2067_v53 }
 0x1c5   :  { %v1089_v20 = vmul.f32 %v1087_v16, %v2444_v26  ;;  %v2064_v16 = vld [vmem:[#allocation13] sm:$0xff] }
 0x1c6   :  { %v1096_v32 = vsub.f32 1.5, %v1095_v27 }
 0x1c7   :  { %v1091_v21 = vadd.f32 1e-05, %v1089_v20 }
 0x1c8   :  { %v1097_v38 = vmul.f32 %v2100_v61, %v1096_v32  ;;  %1404 = vmatpush.bf16.msrb.mxu2 %v2066_v10 }
 0x1c9   :  { %2101 = vrsqrt.f32 %v1091_v21  ;;  %vm1108_vm7 = vweird.f32 %v1091_v21 }
 0x1ca   :  { %v1101_v42 = vsel %vm1100_vm10, %v2100_v61, %v1097_v38  ;;  %v2087_v38 = vld [vmem:[%s2605_s9] ss:$0 sm:$0xff] }
 0x1cc   :  { %1405 = vmatpush.bf16.msrb.mxu2 %v2065_v12 }
 0x1cf   :  { %v2102_v25 = vpop.eup %2101 }
 0x1d0   :  { %v1103_v28 = vmul.f32 %v2102_v25, %v1091_v21  ;;  %vm1109_vm4 = vweird.f32 %v2102_v25  ;;  %1406 = vmatpush.bf16.msrb.mxu2 %v2064_v16 }
 0x1d1   :  { %vm1110_vm8 = vmor %vm1108_vm7, %vm1109_vm4 }
 0x1d2   :  { %v1104_v30 = vmul.f32 %v2102_v25, %v1103_v28  ;;  %v1170_v28 = vld [vmem:[%s2604_s8] sm:$0x1] }
 0x1d4   :  { %v1105_v34 = vmul.f32 0.5, %v1104_v30 }
 0x1d6   :  { %v1106_v36 = vsub.f32 1.5, %v1105_v34 }
 0x1d8   :  { %v1107_v39 = vmul.f32 %v2102_v25, %v1106_v36 }
 0x1da   :  { %v1111_v40 = vsel %vm1110_vm8, %v2102_v25, %v1107_v39 }
 0x1db   :  { %v1114_v9 = vrot.slane %v1111_v40, 7 }
 0x1dd   :  { %v1115_v44 = vsel %vm518_vm5, %v1101_v42, %v1114_v9 }
 0x1de   :  { %v1117_v15 = vmul.f32 %v1115_v44, %v628_v35 }
 0x1e0   :  { %v1119_v45 = vperm.slane %v1117_v15, 0  ;;  %v1120_v18 = vperm.slane %v1117_v15, 1 }
 0x1e2   :  { %v1124_v37 = vmul.f32 %v1120_v18, %v2562_v4  ;;  %v1123_v49 = vmul.f32 %v1119_v45, %v2557_v31 }
 0x1e4   :  { %v1131_v23 = vadd.f32 %v1127_v48, %v1124_v37  ;;  %v1130_v50 = vadd.f32 %v1126_v46, %v1123_v49 }
 0x1e6   :  { %vm1132_vm11 = vcmp.ge.f32.partialorder %v1130_v50, 0.0  ;;  %v1134_v51 = vmul.f32 0.2, %v1130_v50  ;;  %vm1133_vm12 = vcmp.ge.f32.partialorder %v1131_v23, 0.0  ;;  %v1135_v52 = vmul.f32 0.2, %v1131_v23 }
 0x1e8   :  { %v1136_v59 = vsel %vm1132_vm11, %v1130_v50, %v1134_v51  ;;  %v1137_v54 = vsel %vm1133_vm12, %v1131_v23, %v1135_v52 }
 0x1e9   :  { %v1172_v56 = vpack.c.bf16 %v1136_v59, %v1136_v59  ;;  %v1173_v57 = vpack.c.bf16 %v1137_v54, %v1137_v54 }
 0x1eb   :  { %1278 = vmatmul.bf16.vlgmr.msrb.gmra.mxu0 %v1172_v56  ;;  %1291 = vmatmul.bf16.vlgmr.msrb.gmra.mxu1 %v1173_v57 }
 0x268   :  { %v1279_v58 = vpop.f32.mrf.mxu0  ;;  %v1292_v62 = vpop.f32.mrf.mxu1 }
 0x269   :  { %v1293_v0 = vadd.f32 %v1292_v62, %v1279_v58 }
 0x26b   :  { %v1296_v41 = vrot.slane %v1293_v0, 4 }
 0x26d   :  { %v1297_v31 = vadd.f32 %v1296_v41, %v1293_v0 }
 0x26f   :  { %v1298_v3 = vrot.slane %v1297_v31, 2 }
 0x270   :  { %v1281_v4 = vpop.f32.mrf.mxu0  ;;  %v1294_v5 = vpop.f32.mrf.mxu1 }
 0x271   :  { %v1299_v7 = vadd.f32 %v1298_v3, %v1297_v31 }
 0x273   :  { %v1300_v47 = vrot.slane %v1299_v7, 1 }
 0x275   :  { %v1301_v33 = vadd.f32 %v1300_v47, %v1299_v7 }
 0x277   :  { %v1302_v1 = vmul.f32 %v1301_v33, %v2444_v26 }
 0x279   :  { %v1303_v55 = vsub.f32 %v1293_v0, %v1302_v1 }
 0x27b   :  { %v1304_v60 = vmul.f32 %v1303_v55, %v1303_v55 }
 0x27d   :  { %v1305_v29 = vrot.slane %v1304_v60, 4 }
 0x27f   :  { %v1306_v11 = vadd.f32 %v1305_v29, %v1304_v60 }
 0x281   :  { %v1307_v13 = vrot.slane %v1306_v11, 2 }
 0x283   :  { %v1308_v14 = vadd.f32 %v1307_v13, %v1306_v11 }
 0x285   :  { %v1309_v17 = vrot.slane %v1308_v14, 1 }
 0x287   :  { %v1310_v19 = vadd.f32 %v1309_v17, %v1308_v14 }
 0x289   :  { %v1311_v61 = vmul.f32 %v1310_v19, %v2444_v26 }
 0x28b   :  { %v1312_v20 = vadd.f32 1e-05, %v1311_v61 }
 0x28d   :  { %2103 = vrsqrt.f32 %v1312_v20  ;;  %vm1319_vm13 = vweird.f32 %v1312_v20 }
 0x293   :  { %v2104_v21 = vpop.eup %2103 }
 0x294   :  { %v1314_v22 = vmul.f32 %v2104_v21, %v1312_v20  ;;  %vm1320_vm5 = vweird.f32 %v2104_v21 }
 0x295   :  { %vm1321_vm14 = vmor %vm1319_vm13, %vm1320_vm5 }
 0x296   :  { %v1315_v24 = vmul.f32 %v2104_v21, %v1314_v22 }
 0x298   :  { %v1316_v25 = vmul.f32 0.5, %v1315_v24 }
 0x29a   :  { %v1317_v27 = vsub.f32 1.5, %v1316_v25 }
 0x29c   :  { %v1318_v30 = vmul.f32 %v2104_v21, %v1317_v27 }
 0x29e   :  { %v1322_v32 = vsel %vm1321_vm14, %v2104_v21, %v1318_v30 }
 0x29f   :  { %v1323_v34 = vmul.f32 %v1322_v32, %v1170_v28 }
 0x2a1   :  { %v1325_v36 = vperm.slane %v1323_v34, 0 }
 0x2a3   :  { %v1327_v39 = vmul.f32 %v1325_v36, %v1303_v55 }
 0x2a5   :  { %v1331_v40 = vadd.f32 %v2087_v38, %v1327_v39 }
 0x2a7   :  { %v1350_v35 = vpack.c.bf16 %v1331_v40, %v1331_v40 }
 0x2a9   :  { %1407 = vmatmul.bf16.vlgmr.msrb.gmra.mxu2 %v1350_v35 }
 0x32c   :  { %v1408_v9 = vpop.f32.mrf.mxu2 }
 0x32d   :  { %v1412_v42 = vrot.slane %v1408_v9, 4 }
 0x32f   :  { %v1413_v43 = vadd.f32 %v1412_v42, %v1408_v9 }
 0x331   :  { %v1414_v44 = vrot.slane %v1413_v43, 2 }
 0x333   :  { %v1415_v15 = vadd.f32 %v1414_v44, %v1413_v43 }
 0x334   :  { %v1410_v45 = vpop.f32.mrf.mxu2 }
 0x335   :  { %v1416_v18 = vrot.slane %v1415_v15, 1 }
 0x337   :  { %v1417_v46 = vadd.f32 %v1416_v18, %v1415_v15 }
 0x339   :  { %v1418_v48 = vmul.f32 %v1417_v46, %v2444_v26 }
 0x33b   :  { %v1419_v37 = vsub.f32 %v1408_v9, %v1418_v48 }
 0x33d   :  { %v1420_v49 = vmul.f32 %v1419_v37, %v1419_v37 }
 0x33f   :  { %v1421_v23 = vrot.slane %v1420_v49, 4 }
 0x341   :  { %v1422_v50 = vadd.f32 %v1421_v23, %v1420_v49 }
 0x343   :  { %v1423_v51 = vrot.slane %v1422_v50, 2 }
 0x345   :  { %v1424_v52 = vadd.f32 %v1423_v51, %v1422_v50 }
 0x347   :  { %v1425_v59 = vrot.slane %v1424_v52, 1 }
 0x349   :  { %v1426_v54 = vadd.f32 %v1425_v59, %v1424_v52 }
 0x34b   :  { %v1427_v56 = vmul.f32 %v1426_v54, %v2444_v26  ;;  %v2088_v26 = vld [vmem:[%s2608_s12] ss:$0 sm:$0xff] }
 0x34d   :  { %v1428_v57 = vadd.f32 1e-05, %v1427_v56 }
 0x34f   :  { %2105 = vrsqrt.f32 %v1428_v57  ;;  %vm1435_vm0 = vweird.f32 %v1428_v57 }
 0x355   :  { %v2106_v58 = vpop.eup %2105 }
 0x356   :  { %v1430_v62 = vmul.f32 %v2106_v58, %v1428_v57  ;;  %vm1436_vm15 = vweird.f32 %v2106_v58 }
 0x357   :  { %vm1437_vm1 = vmor %vm1435_vm0, %vm1436_vm15 }
 0x358   :  { %v1431_v63 = vmul.f32 %v2106_v58, %v1430_v62 }
 0x35a   :  { %v1432_v0 = vmul.f32 0.5, %v1431_v63 }
 0x35c   :  { %v1433_v41 = vsub.f32 1.5, %v1432_v0 }
 0x35e   :  { %v1434_v31 = vmul.f32 %v2106_v58, %v1433_v41 }
 0x360   :  { %v1438_v3 = vsel %vm1437_vm1, %v2106_v58, %v1434_v31 }
 0x361   :  { %v1439_v4 = vmul.f32 %v1438_v3, %v1348_v2 }
 0x363   :  { %v1441_v5 = vperm.slane %v1439_v4, 0 }
 0x365   :  { %v1443_v6 = vmul.f32 %v1441_v5, %v1419_v37 }
 0x367   :  { %v1447_v7 = vadd.f32 %v2088_v26, %v1443_v6 }
 0x369   :  { %vm1448_vm2 = vcmp.ge.f32.partialorder %v1447_v7, 0.0  ;;  %v1449_v47 = vmul.f32 0.2, %v1447_v7 }
 0x36b   :  { %v1450_v8 = vsel %vm1448_vm2, %v1447_v7, %v1449_v47 }
 0x36c   :  { %1451 = vst [vmem:[#allocation14] sm:$0xff] %v1450_v8 }
 0x36d   :  { %1462 = dma.vmem_to_hbm [thread:$0]  %s1458_s14, 128, %s1460_s0, [#allocation4]  }
 0x36e   :  { %2307 = dma.done.wait [#allocation4], 128  }
 0x36f   :  { %2308 = vsyncadd [#allocation4], 4294967168 }
 0x370   :  { %1467 = vsyncpa [#allocation3], 1 }
 0x371   :  { %1468 = vsyncpa [#allocation6], 1 }
 0x372   :  { %1469 = vsyncpa [#allocation9], 1 }
 0x373   :  { %1470 = vsyncpa [#allocation12], 1 }
 0x374   :  { %1471 = vsyncpa [#allocation4], 1 }

</bundles_post_ra>
